<compile_context>
chip_gen: v6e
topology: v6e:2x2x1
jax: 0.10.0
libtpu: 0.0.40
codegen_flags: <defaults>
</compile_context>

<pallas_src>
import jax
import jax.numpy as jnp
from jax.experimental import pallas as pl
from jax.experimental.pallas import tpu as pltpu

_LANE = 128
_SUBLANE = 8


def _round_up(x: int, m: int) -> int:
    return ((x + m - 1) // m) * m


def _is_megacore() -> bool:
    """Heuristic: v7x chips expose 2 TensorCores; keep >=2 grid steps there."""
    try:
        kind = jax.devices()[0].device_kind.lower()
    except Exception:
        return False
    return "v7" in kind


def _f2_kernel(x_ref, w0_ref, b0_ref, w1_ref, b1_ref, w2_ref, b2_ref, o_ref):
    w0 = w0_ref[...]
    w1 = w1_ref[...]
    w2 = w2_ref[...]

    # Cast x to the compute (weight) dtype on the VPU: no extra HBM pass.
    x = x_ref[...].astype(w0.dtype)

    # Layer 0: MXU matmul with f32 accumulation; f32 bias-add + ReLU on the VPU.
    h = jnp.dot(x, w0, preferred_element_type=jnp.float32)
    h = jnp.maximum(h + b0_ref[...], 0.0)

    # Layer 1.
    h = jnp.dot(h.astype(w1.dtype), w1, preferred_element_type=jnp.float32)
    h = jnp.maximum(h + b1_ref[...], 0.0)

    # Layer 2: no activation (matches F2.forward).
    out = jnp.dot(h.astype(w2.dtype), w2, preferred_element_type=jnp.float32)
    o_ref[...] = (out + b2_ref[...]).astype(o_ref.dtype)


def prepare_params(w0, b0, w1, b1, w2, b2, compute_dtype=jnp.float32):
    """One-time padding/casting of the weights (hoisted out of the forward)."""
    compute_dtype = jnp.dtype(compute_dtype)
    d, h0 = w0.shape
    h1 = w1.shape[1]
    k = w2.shape[1]
    h0_p = _round_up(h0, _LANE)
    h1_p = _round_up(h1, _LANE)
    f32 = jnp.float32

    w0p = jnp.zeros((d, h0_p), compute_dtype).at[:, :h0].set(w0.astype(compute_dtype))
    w1p = jnp.zeros((h0_p, h1_p), compute_dtype).at[:h0, :h1].set(w1.astype(compute_dtype))
    w2p = jnp.zeros((h1_p, k), compute_dtype).at[:h1, :].set(w2.astype(compute_dtype))
    b0p = jnp.zeros((1, h0_p), f32).at[0, :h0].set(b0.astype(f32))
    b1p = jnp.zeros((1, h1_p), f32).at[0, :h1].set(b1.astype(f32))
    b2p = b2.astype(f32).reshape(1, k)

    return {
        "w0p": w0p, "b0p": b0p,
        "w1p": w1p, "b1p": b1p,
        "w2p": w2p, "b2p": b2p,
        "dims": (d, h0, h1, k),
    }


def f2_forward(x, params, *, block_n=None):
    """Fused forward pass of F2 using pre-padded params from prepare_params()."""
    n, d = x.shape
    d_p, h0, h1, k = params["dims"]
    assert d == d_p, f"x feature dim {d} != param dim {d_p}"

    w0p, b0p = params["w0p"], params["b0p"]
    w1p, b1p = params["w1p"], params["b1p"]
    w2p, b2p = params["w2p"], params["b2p"]
    h0_p = w0p.shape[1]
    h1_p = w1p.shape[1]
    out_dtype = x.dtype

    # Batch tile: fat tiles, few grid steps.  Single step on single-TC parts,
    # >= 2 parallel steps on megacore (v7x), capped at 1024 rows for large n.
    if block_n is None:
        min_steps = 2 if _is_megacore() else 1
        block_n = min(1024, _round_up(pl.cdiv(_round_up(n, _SUBLANE), min_steps),
                                      _SUBLANE))
    block_n = max(_SUBLANE, (block_n // _SUBLANE) * _SUBLANE)
    grid_n = pl.cdiv(n, block_n)

    # VMEM footprint: double-buffered x/out tiles, (double-buffered) resident
    # weights + biases, f32 intermediates; + ~4 MiB headroom, < v7x 64 MiB.
    act_bytes = jnp.dtype(w0p.dtype).itemsize
    x_bytes = jnp.dtype(x.dtype).itemsize
    o_bytes = jnp.dtype(out_dtype).itemsize
    footprint = (2 * block_n * d * x_bytes
                 + 2 * block_n * k * o_bytes
                 + 2 * ((d * h0_p + h0_p * h1_p + h1_p * k) * act_bytes
                        + (h0_p + h1_p + k) * 4)
                 + 2 * block_n * max(h0_p, h1_p) * 4)
    vmem_limit = int(min(footprint + (4 << 20), 56 << 20))

    flops = 2 * n * (d * h0_p + h0_p * h1_p + h1_p * k)
    bytes_accessed = (n * d * x_bytes
                      + (w0p.size + w1p.size + w2p.size) * act_bytes
                      + (b0p.size + b1p.size + b2p.size) * 4
                      + n * k * o_bytes)

    return pl.pallas_call(
        _f2_kernel,
        out_shape=jax.ShapeDtypeStruct((n, k), out_dtype),
        grid_spec=pltpu.PrefetchScalarGridSpec(
            num_scalar_prefetch=0,
            grid=(grid_n,),
            in_specs=[
                pl.BlockSpec((block_n, d), lambda i: (i, 0)),   # x (unpadded)
                pl.BlockSpec((d, h0_p), lambda i: (0, 0)),      # W0 (resident)
                pl.BlockSpec((1, h0_p), lambda i: (0, 0)),      # b0
                pl.BlockSpec((h0_p, h1_p), lambda i: (0, 0)),   # W1
                pl.BlockSpec((1, h1_p), lambda i: (0, 0)),      # b1
                pl.BlockSpec((h1_p, k), lambda i: (0, 0)),      # W2 (true k cols)
                pl.BlockSpec((1, k), lambda i: (0, 0)),         # b2
            ],
            out_specs=pl.BlockSpec((block_n, k), lambda i: (i, 0)),
        ),
        compiler_params=pltpu.CompilerParams(
            dimension_semantics=("parallel",),
            vmem_limit_bytes=vmem_limit,
        ),
        cost_estimate=pl.CostEstimate(
            flops=int(flops), transcendentals=0,
            bytes_accessed=int(bytes_accessed)),
    )(x, w0p, b0p, w1p, b1p, w2p, b2p)


def f2_reference(x, w0, b0, w1, b1, w2, b2, compute_dtype=jnp.float32):
    cd = compute_dtype
    h = jnp.dot(x.astype(cd), w0.astype(cd), preferred_element_type=jnp.float32) + b0
    h = jnp.maximum(h, 0.0)
    h = jnp.dot(h.astype(cd), w1.astype(cd), preferred_element_type=jnp.float32) + b1
    h = jnp.maximum(h, 0.0)
    return jnp.dot(h.astype(cd), w2.astype(cd), preferred_element_type=jnp.float32) + b2


if __name__ == "__main__":
    # Small shapes consistent with F2(h0, h1, d, k) applied to an (n, d) batch.
    n, d, h0, h1, k = 512, 32, 64, 32, 16

    key = jax.random.PRNGKey(0)
    kx, k0, k1, k2 = jax.random.split(key, 4)

    # Deterministic init mirroring the module: torch.rand -> U[0,1), biases zero.
    x = jax.random.uniform(kx, (n, d), dtype=jnp.float32)
    w0 = jax.random.uniform(k0, (d, h0), dtype=jnp.float32)
    w1 = jax.random.uniform(k1, (h0, h1), dtype=jnp.float32)
    w2 = jax.random.uniform(k2, (h1, k), dtype=jnp.float32)
    b0 = jnp.zeros((h0,), dtype=jnp.float32)
    b1 = jnp.zeros((h1,), dtype=jnp.float32)
    b2 = jnp.zeros((k,), dtype=jnp.float32)

    # --- f32 compute path: pad/cast weights ONCE, then run the fused kernel. ---
    params_f32 = prepare_params(w0, b0, w1, b1, w2, b2, compute_dtype=jnp.float32)
    out_f32 = jax.block_until_ready(f2_forward(x, params_f32))
    ref_f32 = f2_reference(x, w0, b0, w1, b1, w2, b2)
    assert out_f32.shape == (n, k)
    assert jnp.allclose(out_f32, ref_f32, rtol=1e-4, atol=1e-2), "f32 mismatch"

    # --- bf16 MXU path (f32 accumulation / bias / ReLU), vs bf16-cast reference. ---
    params_bf16 = prepare_params(w0, b0, w1, b1, w2, b2, compute_dtype=jnp.bfloat16)
    out_bf16 = jax.block_until_ready(f2_forward(x, params_bf16))
    ref_bf16 = f2_reference(x, w0, b0, w1, b1, w2, b2, compute_dtype=jnp.bfloat16)
    assert out_bf16.shape == (n, k)
    assert jnp.allclose(out_bf16, ref_bf16, rtol=2e-2, atol=1e-1), "bf16 mismatch"

    print("KERNEL_OK")
</pallas_src>

<mosaic_0001>
module attributes {stable_mosaic.version = 11 : i64} {
  func.func @_f2_kernel(%arg0: i32, %arg1: memref<512x32xf32, #tpu.memory_space<vmem>>, %arg2: memref<32x128xf32, #tpu.memory_space<vmem>>, %arg3: memref<1x128xf32, #tpu.memory_space<vmem>>, %arg4: memref<128x128xf32, #tpu.memory_space<vmem>>, %arg5: memref<1x128xf32, #tpu.memory_space<vmem>>, %arg6: memref<128x16xf32, #tpu.memory_space<vmem>>, %arg7: memref<1x16xf32, #tpu.memory_space<vmem>>, %arg8: memref<512x16xf32, #tpu.memory_space<vmem>>) attributes {dimension_semantics = [#tpu.dimension_semantics<parallel>], iteration_bounds = array<i64: 1>, scalar_prefetch = 0 : i64, scratch_operands = 0 : i64, tpu.core_type = #tpu.core_type<tc>, window_params = [{transform_indices = @transform_0, window_bounds = array<i64: 512, 32>}, {pipeline_mode = #tpu.pipeline_mode<synchronous>, transform_indices = @transform_1, window_bounds = array<i64: 32, 128>}, {pipeline_mode = #tpu.pipeline_mode<synchronous>, transform_indices = @transform_2, window_bounds = array<i64: 1, 128>}, {pipeline_mode = #tpu.pipeline_mode<synchronous>, transform_indices = @transform_3, window_bounds = array<i64: 128, 128>}, {pipeline_mode = #tpu.pipeline_mode<synchronous>, transform_indices = @transform_4, window_bounds = array<i64: 1, 128>}, {pipeline_mode = #tpu.pipeline_mode<synchronous>, transform_indices = @transform_5, window_bounds = array<i64: 128, 16>}, {pipeline_mode = #tpu.pipeline_mode<synchronous>, transform_indices = @transform_6, window_bounds = array<i64: 1, 16>}, {transform_indices = @transform_7, window_bounds = array<i64: 512, 16>}]} {
    %c0 = arith.constant 0 : index
    %c0_0 = arith.constant 0 : index
    %0 = vector.load %arg2[%c0, %c0_0] : memref<32x128xf32, #tpu.memory_space<vmem>>, vector<32x128xf32>
    %c0_1 = arith.constant 0 : index
    %c0_2 = arith.constant 0 : index
    %1 = vector.load %arg4[%c0_1, %c0_2] : memref<128x128xf32, #tpu.memory_space<vmem>>, vector<128x128xf32>
    %c0_3 = arith.constant 0 : index
    %c0_4 = arith.constant 0 : index
    %2 = vector.load %arg6[%c0_3, %c0_4] : memref<128x16xf32, #tpu.memory_space<vmem>>, vector<128x16xf32>
    %c0_5 = arith.constant 0 : index
    %c0_6 = arith.constant 0 : index
    %3 = vector.load %arg1[%c0_5, %c0_6] : memref<512x32xf32, #tpu.memory_space<vmem>>, vector<512x32xf32>
    %cst = arith.constant dense<0.000000e+00> : vector<512x128xf32>
    %4 = tpu.matmul %3, %0, %cst {dimension_numbers = #tpu.dot_dimension_numbers<[1], [0], [0], [1], [0, 0, 1, 1], [], []>} : vector<512x32xf32>, vector<32x128xf32>, vector<512x128xf32> -> vector<512x128xf32>
    %c0_7 = arith.constant 0 : index
    %c0_8 = arith.constant 0 : index
    %5 = vector.load %arg3[%c0_7, %c0_8] : memref<1x128xf32, #tpu.memory_space<vmem>>, vector<1x128xf32>
    %6 = vector.broadcast %5 : vector<1x128xf32> to vector<512x128xf32>
    %7 = arith.addf %4, %6 : vector<512x128xf32>
    %cst_9 = arith.constant 0.000000e+00 : f32
    %8 = vector.broadcast %cst_9 : f32 to vector<512x128xf32>
    %9 = arith.maximumf %7, %8 : vector<512x128xf32>
    %cst_10 = arith.constant dense<0.000000e+00> : vector<512x128xf32>
    %10 = tpu.matmul %9, %1, %cst_10 {dimension_numbers = #tpu.dot_dimension_numbers<[1], [0], [0], [1], [0, 0, 1, 1], [], []>} : vector<512x128xf32>, vector<128x128xf32>, vector<512x128xf32> -> vector<512x128xf32>
    %c0_11 = arith.constant 0 : index
    %c0_12 = arith.constant 0 : index
    %11 = vector.load %arg5[%c0_11, %c0_12] : memref<1x128xf32, #tpu.memory_space<vmem>>, vector<1x128xf32>
    %12 = vector.broadcast %11 : vector<1x128xf32> to vector<512x128xf32>
    %13 = arith.addf %10, %12 : vector<512x128xf32>
    %cst_13 = arith.constant 0.000000e+00 : f32
    %14 = vector.broadcast %cst_13 : f32 to vector<512x128xf32>
    %15 = arith.maximumf %13, %14 : vector<512x128xf32>
    %cst_14 = arith.constant dense<0.000000e+00> : vector<512x16xf32>
    %16 = tpu.matmul %15, %2, %cst_14 {dimension_numbers = #tpu.dot_dimension_numbers<[1], [0], [0], [1], [0, 0, 1, 1], [], []>} : vector<512x128xf32>, vector<128x16xf32>, vector<512x16xf32> -> vector<512x16xf32>
    %c0_15 = arith.constant 0 : index
    %c0_16 = arith.constant 0 : index
    %17 = vector.load %arg7[%c0_15, %c0_16] : memref<1x16xf32, #tpu.memory_space<vmem>>, vector<1x16xf32>
    %18 = vector.broadcast %17 : vector<1x16xf32> to vector<512x16xf32>
    %19 = arith.addf %16, %18 : vector<512x16xf32>
    %c0_17 = arith.constant 0 : index
    %c0_18 = arith.constant 0 : index
    %20 = vector.load %arg8[%c0_17, %c0_18] : memref<512x16xf32, #tpu.memory_space<vmem>>, vector<512x16xf32>
    tpu.vector_store %arg8[%c0_17, %c0_18], %19 {strides = array<i32>} : memref<512x16xf32, #tpu.memory_space<vmem>>, vector<512x16xf32>,
    return
  }
  func.func @transform_0(%arg0: i32) -> (i32, i32) {
    %c0_i32 = arith.constant 0 : i32
    %c0_i32_0 = arith.constant 0 : i32
    return %arg0, %c0_i32 : i32, i32
  }
  func.func @transform_1(%arg0: i32) -> (i32, i32) {
    %c0_i32 = arith.constant 0 : i32
    %c0_i32_0 = arith.constant 0 : i32
    %c0_i32_1 = arith.constant 0 : i32
    return %c0_i32, %c0_i32_0 : i32, i32
  }
  func.func @transform_2(%arg0: i32) -> (i32, i32) {
    %c0_i32 = arith.constant 0 : i32
    %c0_i32_0 = arith.constant 0 : i32
    %c0_i32_1 = arith.constant 0 : i32
    return %c0_i32, %c0_i32_0 : i32, i32
  }
  func.func @transform_3(%arg0: i32) -> (i32, i32) {
    %c0_i32 = arith.constant 0 : i32
    %c0_i32_0 = arith.constant 0 : i32
    %c0_i32_1 = arith.constant 0 : i32
    return %c0_i32, %c0_i32_0 : i32, i32
  }
  func.func @transform_4(%arg0: i32) -> (i32, i32) {
    %c0_i32 = arith.constant 0 : i32
    %c0_i32_0 = arith.constant 0 : i32
    %c0_i32_1 = arith.constant 0 : i32
    return %c0_i32, %c0_i32_0 : i32, i32
  }
  func.func @transform_5(%arg0: i32) -> (i32, i32) {
    %c0_i32 = arith.constant 0 : i32
    %c0_i32_0 = arith.constant 0 : i32
    %c0_i32_1 = arith.constant 0 : i32
    return %c0_i32, %c0_i32_0 : i32, i32
  }
  func.func @transform_6(%arg0: i32) -> (i32, i32) {
    %c0_i32 = arith.constant 0 : i32
    %c0_i32_0 = arith.constant 0 : i32
    %c0_i32_1 = arith.constant 0 : i32
    return %c0_i32, %c0_i32_0 : i32, i32
  }
  func.func @transform_7(%arg0: i32) -> (i32, i32) {
    %c0_i32 = arith.constant 0 : i32
    %c0_i32_0 = arith.constant 0 : i32
    return %arg0, %c0_i32 : i32, i32
  }
}

</mosaic_0001>

<bundles_post_ra>
// kernel: tpu_custom_call.1
= control target key start
LH: loop header
LB: loop body
LE: loop exit
PB: predicated region body
PF: predicated region fallthrough
CT: control target
= control target key end

     0   :  { %vm133_vm0 = vcmask 261120   ;;  %vm1623_vm1 = vcmask 130048   ;;  %s3276_s1 = inlined_call_operand.vmem [shape: f32[32,128], index: 1, kind: input, shape index: {}]   ;;  %s3277_s0 = inlined_call_operand.vmem [shape: f32[512,32], index: 0, kind: input, shape index: {}]   ;;  %s3278_s3 = inlined_call_operand.vmem [shape: f32[128,128], index: 3, kind: input, shape index: {}]   ;;  %s3279_s2 = inlined_call_operand.vmem [shape: f32[1,128], index: 2, kind: input, shape index: {}]   ;;  %s3280_s5 = inlined_call_operand.vmem [shape: f32[128,16], index: 5, kind: input, shape index: {}]   ;;  %s3281_s4 = inlined_call_operand.vmem [shape: f32[1,128], index: 4, kind: input, shape index: {}]   ;;  %s3282_s6 = inlined_call_operand.vmem [shape: f32[1,16], index: 6, kind: input, shape index: {}]   ;;  %s3283_s7 = inlined_call_operand.vmem [shape: f32[512,16], index: 7, kind: output, shape index: {}]  }
   0x1   :  { %v29_v0 = vld [vmem:[%s3276_s1 + $0x18] sm:$0xff]  ;;  %v28_v1 = vld [vmem:[%s3276_s1 + $0x10] sm:$0xff]  ;;  %v62_v2 = vld [vmem:[%s3277_s0] sm:$0xff] }
   0x2   :  { %1987 = vmatprep.subr.mxu0 %v29_v0  ;;  %2347 = vmatprep.subr.mxu1 %v29_v0  ;;  %v27_v3 = vld [vmem:[%s3276_s1 + $0x8] sm:$0xff]  ;;  %v26_v4 = vld [vmem:[%s3276_s1] sm:$0xff]  ;;  %v64_v6 = vld [vmem:[%s3277_s0 + $0x10] sm:$0xff] }
   0x3   :  { %1988 = vmatpush3.msra.mxu0 %v29_v0  ;;  %1995 = vmatprep.mubr.msk.f32.mxu0 %vm133_vm0, %v62_v2  ;;  %v63_v5 = vld [vmem:[%s3277_s0 + $0x8] sm:$0xff]  ;;  %v65_v7 = vld [vmem:[%s3277_s0 + $0x18] sm:$0xff]  ;;  %v66_v8 = vld [vmem:[%s3277_s0 + $0x20] sm:$0xff] }
   0x4   :  { %1989 = vmatprep.subr.mxu0 %v28_v1  ;;  %2351 = vmatpush3.msra.mxu1 %v29_v0  ;;  %v94_v9 = vld [vmem:[%s3277_s0 + $0x100] sm:$0xff]  ;;  %v95_v10 = vld [vmem:[%s3277_s0 + $0x108] sm:$0xff]  ;;  %v96_v11 = vld [vmem:[%s3277_s0 + $0x110] sm:$0xff] }
   0x5   :  { %1990 = vmatpush3.msra.mxu0 %v28_v1  ;;  %2348 = vmatprep.subr.mxu1 %v28_v1  ;;  %v67_v12 = vld [vmem:[%s3277_s0 + $0x28] sm:$0xff]  ;;  %v68_v13 = vld [vmem:[%s3277_s0 + $0x30] sm:$0xff]  ;;  %v97_v14 = vld [vmem:[%s3277_s0 + $0x118] sm:$0xff] }
   0x6   :  { %1991 = vmatprep.subr.mxu0 %v27_v3  ;;  %2352 = vmatpush3.msra.mxu1 %v28_v1  ;;  %v98_v15 = vld [vmem:[%s3277_s0 + $0x120] sm:$0xff]  ;;  %v69_v16 = vld [vmem:[%s3277_s0 + $0x38] sm:$0xff]  ;;  %v99_v18 = vld [vmem:[%s3277_s0 + $0x128] sm:$0xff] }
   0x7   :  { %1992 = vmatpush3.msra.mxu0 %v27_v3  ;;  %2349 = vmatprep.subr.mxu1 %v27_v3  ;;  %v70_v17 = vld [vmem:[%s3277_s0 + $0x40] sm:$0xff]  ;;  %v100_v19 = vld [vmem:[%s3277_s0 + $0x130] sm:$0xff]  ;;  %v71_v20 = vld [vmem:[%s3277_s0 + $0x48] sm:$0xff] }
   0x8   :  { %1993 = vmatprep.subr.mxu0 %v26_v4  ;;  %2353 = vmatpush3.msra.mxu1 %v27_v3  ;;  %v45_v21 = vld [vmem:[%s3278_s3 + $0x78] sm:$0xff]  ;;  %v72_v22 = vld [vmem:[%s3277_s0 + $0x50] sm:$0xff]  ;;  %v102_v25 = vld [vmem:[%s3277_s0 + $0x140] sm:$0xff] }
   0x9   :  { %1994 = vmatpush3.msra.mxu0 %v26_v4  ;;  %2350 = vmatprep.subr.mxu1 %v26_v4  ;;  %v101_v23 = vld [vmem:[%s3277_s0 + $0x138] sm:$0xff]  ;;  %v44_v24 = vld [vmem:[%s3278_s3 + $0x70] sm:$0xff]  ;;  %v43_v26 = vld [vmem:[%s3278_s3 + $0x68] sm:$0xff] }
   0xa   :  { %1996 = vmatmul.mubr.msk.f32.vlgmr.msra.gmra.mxu0 %vm133_vm0, %v63_v5  ;;  %2354 = vmatpush3.msra.mxu1 %v26_v4  ;;  %v73_v27 = vld [vmem:[%s3277_s0 + $0x58] sm:$0xff]  ;;  %v74_v28 = vld [vmem:[%s3277_s0 + $0x60] sm:$0xff]  ;;  %v103_v29 = vld [vmem:[%s3277_s0 + $0x148] sm:$0xff] }
   0xb   :  { %1998 = vmatprep.mubr.msk.f32.mxu0 %vm133_vm0, %v64_v6  ;;  %2043 = vmatprep.mubr.msk.f32.mxu1 %vm133_vm0, %v94_v9  ;;  %v104_v30 = vld [vmem:[%s3277_s0 + $0x150] sm:$0xff]  ;;  %v42_v31 = vld [vmem:[%s3278_s3 + $0x60] sm:$0xff]  ;;  %v75_v32 = vld [vmem:[%s3277_s0 + $0x68] sm:$0xff] }
   0xc   :  { %2044 = vmatmul.mubr.msk.f32.vlgmr.msra.gmra.mxu1 %vm133_vm0, %v95_v10  ;;  %2091 = vmatprep.subr.mxu1 %v45_v21  ;;  %v41_v33 = vld [vmem:[%s3278_s3 + $0x58] sm:$0xff]  ;;  %v76_v34 = vld [vmem:[%s3277_s0 + $0x70] sm:$0xff]  ;;  %v106_v36 = vld [vmem:[%s3277_s0 + $0x160] sm:$0xff] }
   0xd   :  { %2046 = vmatprep.mubr.msk.f32.mxu1 %vm133_vm0, %v96_v11  ;;  %2092 = vmatpush3.msra.mxu1 %v45_v21  ;;  %v105_v35 = vld [vmem:[%s3277_s0 + $0x158] sm:$0xff]  ;;  %v40_v37 = vld [vmem:[%s3278_s3 + $0x50] sm:$0xff]  ;;  %v78_v39 = vld [vmem:[%s3277_s0 + $0x80] sm:$0xff] }
   0xe   :  { %1999 = vmatmul.mubr.msk.f32.gmra.mxu0 %vm133_vm0, %v65_v7  ;;  %2093 = vmatprep.subr.mxu1 %v44_v24  ;;  %v77_v38 = vld [vmem:[%s3277_s0 + $0x78] sm:$0xff]  ;;  %v107_v40 = vld [vmem:[%s3277_s0 + $0x168] sm:$0xff]  ;;  %v108_v41 = vld [vmem:[%s3277_s0 + $0x170] sm:$0xff] }
   0xf   :  { %2001 = vmatprep.mubr.msk.f32.mxu0 %vm133_vm0, %v66_v8  ;;  %2094 = vmatpush3.msra.mxu1 %v44_v24  ;;  %v39_v42 = vld [vmem:[%s3278_s3 + $0x48] sm:$0xff]  ;;  %v38_v44 = vld [vmem:[%s3278_s3 + $0x40] sm:$0xff]  ;;  %v80_v45 = vld [vmem:[%s3277_s0 + $0x90] sm:$0xff] }
  0x10   :  { %2047 = vmatmul.mubr.msk.f32.gmra.mxu1 %vm133_vm0, %v97_v14  ;;  %2095 = vmatprep.subr.mxu1 %v43_v26  ;;  %v79_v43 = vld [vmem:[%s3277_s0 + $0x88] sm:$0xff]  ;;  %v109_v46 = vld [vmem:[%s3277_s0 + $0x178] sm:$0xff]  ;;  %v110_v47 = vld [vmem:[%s3277_s0 + $0x180] sm:$0xff] }
  0x11   :  { %2049 = vmatprep.mubr.msk.f32.mxu1 %vm133_vm0, %v98_v15  ;;  %2096 = vmatpush3.msra.mxu1 %v43_v26  ;;  %v37_v48 = vld [vmem:[%s3278_s3 + $0x38] sm:$0xff]  ;;  %v82_v50 = vld [vmem:[%s3277_s0 + $0xa0] sm:$0xff]  ;;  %v111_v51 = vld [vmem:[%s3277_s0 + $0x188] sm:$0xff] }
  0x12   :  { %2002 = vmatmul.mubr.msk.f32.gmra.mxu0 %vm133_vm0, %v67_v12  ;;  %2097 = vmatprep.subr.mxu1 %v42_v31  ;;  %v81_v49 = vld [vmem:[%s3277_s0 + $0x98] sm:$0xff]  ;;  %v112_v52 = vld [vmem:[%s3277_s0 + $0x190] sm:$0xff]  ;;  %v83_v54 = vld [vmem:[%s3277_s0 + $0xa8] sm:$0xff] }
  0x13   :  { %2004 = vmatprep.mubr.msk.f32.mxu0 %vm133_vm0, %v68_v13  ;;  %2098 = vmatpush3.msra.mxu1 %v42_v31  ;;  %v36_v53 = vld [vmem:[%s3278_s3 + $0x30] sm:$0xff]  ;;  %v35_v55 = vld [vmem:[%s3278_s3 + $0x28] sm:$0xff]  ;;  %v113_v57 = vld [vmem:[%s3277_s0 + $0x198] sm:$0xff] }
  0x14   :  { %2050 = vmatmul.mubr.msk.f32.gmra.mxu1 %vm133_vm0, %v99_v18  ;;  %2099 = vmatprep.subr.mxu1 %v41_v33  ;;  %v84_v56 = vld [vmem:[%s3277_s0 + $0xb0] sm:$0xff]  ;;  %v114_v58 = vld [vmem:[%s3277_s0 + $0x1a0] sm:$0xff]  ;;  %v85_v60 = vld [vmem:[%s3277_s0 + $0xb8] sm:$0xff] }
  0x15   :  { %2052 = vmatprep.mubr.msk.f32.mxu1 %vm133_vm0, %v100_v19  ;;  %2100 = vmatpush3.msra.mxu1 %v41_v33  ;;  %v34_v59 = vld [vmem:[%s3278_s3 + $0x20] sm:$0xff]  ;;  %v115_v62 = vld [vmem:[%s3277_s0 + $0x1a8] sm:$0xff]  ;;  %v116_v63 = vld [vmem:[%s3277_s0 + $0x1b0] sm:$0xff] }
  0x16   :  { %2005 = vmatmul.mubr.msk.f32.gmra.mxu0 %vm133_vm0, %v69_v16  ;;  %2101 = vmatprep.subr.mxu1 %v40_v37  ;;  %v86_v61 = vld [vmem:[%s3277_s0 + $0xc0] sm:$0xff]  ;;  %v33_v0 = vld [vmem:[%s3278_s3 + $0x18] sm:$0xff]  ;;  %v87_v1 = vld [vmem:[%s3277_s0 + $0xc8] sm:$0xff] }
  0x17   :  { %2007 = vmatprep.mubr.msk.f32.mxu0 %vm133_vm0, %v70_v17  ;;  %2102 = vmatpush3.msra.mxu1 %v40_v37  ;;  %v32_v2 = vld [vmem:[%s3278_s3 + $0x10] sm:$0xff]  ;;  %v117_v4 = vld [vmem:[%s3277_s0 + $0x1b8] sm:$0xff]  ;;  %v118_v5 = vld [vmem:[%s3277_s0 + $0x1c0] sm:$0xff] }
  0x18   :  { %2053 = vmatmul.mubr.msk.f32.gmra.mxu1 %vm133_vm0, %v101_v23  ;;  %2103 = vmatprep.subr.mxu1 %v39_v42  ;;  %v88_v3 = vld [vmem:[%s3277_s0 + $0xd0] sm:$0xff]  ;;  %v31_v6 = vld [vmem:[%s3278_s3 + $0x8] sm:$0xff]  ;;  %v89_v7 = vld [vmem:[%s3277_s0 + $0xd8] sm:$0xff] }
  0x19   :  { %2055 = vmatprep.mubr.msk.f32.mxu1 %vm133_vm0, %v102_v25  ;;  %2104 = vmatpush3.msra.mxu1 %v39_v42  ;;  %v90_v8 = vld [vmem:[%s3277_s0 + $0xe0] sm:$0xff]  ;;  %v119_v9 = vld [vmem:[%s3277_s0 + $0x1c8] sm:$0xff]  ;;  %v120_v10 = vld [vmem:[%s3277_s0 + $0x1d0] sm:$0xff] }
  0x1a   :  { %2008 = vmatmul.mubr.msk.f32.gmra.mxu0 %vm133_vm0, %v71_v20  ;;  %2105 = vmatprep.subr.mxu1 %v38_v44  ;;  %v91_v11 = vld [vmem:[%s3277_s0 + $0xe8] sm:$0xff]  ;;  %v92_v12 = vld [vmem:[%s3277_s0 + $0xf0] sm:$0xff]  ;;  %v121_v13 = vld [vmem:[%s3277_s0 + $0x1d8] sm:$0xff] }
  0x1b   :  { %2010 = vmatprep.mubr.msk.f32.mxu0 %vm133_vm0, %v72_v22  ;;  %2106 = vmatpush3.msra.mxu1 %v38_v44  ;;  %v122_v14 = vld [vmem:[%s3277_s0 + $0x1e0] sm:$0xff]  ;;  %v93_v15 = vld [vmem:[%s3277_s0 + $0xf8] sm:$0xff]  ;;  %v123_v16 = vld [vmem:[%s3277_s0 + $0x1e8] sm:$0xff] }
  0x1c   :  { %2056 = vmatmul.mubr.msk.f32.gmra.mxu1 %vm133_vm0, %v103_v29  ;;  %2107 = vmatprep.subr.mxu1 %v37_v48  ;;  %v124_v17 = vld [vmem:[%s3277_s0 + $0x1f0] sm:$0xff]  ;;  %v125_v18 = vld [vmem:[%s3277_s0 + $0x1f8] sm:$0xff]  ;;  %v30_v19 = vld [vmem:[%s3278_s3] sm:$0xff] }
  0x1d   :  { %2058 = vmatprep.mubr.msk.f32.mxu1 %vm133_vm0, %v104_v30  ;;  %2108 = vmatpush3.msra.mxu1 %v37_v48  ;;  %v2714_v20 = vld [vmem:[%s3279_s2] ss:$0 sm:$0xff]  ;;  %v60_v29 = vld [vmem:[%s3280_s5 + $0x70] sm:$0xff] }
  0x1e   :  { %2011 = vmatmul.mubr.msk.f32.gmra.mxu0 %vm133_vm0, %v73_v27  ;;  %2109 = vmatprep.subr.mxu1 %v36_v53 }
  0x1f   :  { %2013 = vmatprep.mubr.msk.f32.mxu0 %vm133_vm0, %v74_v28  ;;  %2110 = vmatpush3.msra.mxu1 %v36_v53  ;;  %v61_v28 = vld [vmem:[%s3280_s5 + $0x78] sm:$0xff] }
  0x20   :  { %2059 = vmatmul.mubr.msk.f32.gmra.mxu1 %vm133_vm0, %v105_v35  ;;  %2111 = vmatprep.subr.mxu1 %v35_v55  ;;  %v59_v35 = vld [vmem:[%s3280_s5 + $0x68] sm:$0xff] }
  0x21   :  { %2061 = vmatprep.mubr.msk.f32.mxu1 %vm133_vm0, %v106_v36  ;;  %2112 = vmatpush3.msra.mxu1 %v35_v55  ;;  %v55_v55 = vld [vmem:[%s3280_s5 + $0x48] sm:$0xff] }
  0x22   :  { %2014 = vmatmul.mubr.msk.f32.gmra.mxu0 %vm133_vm0, %v75_v32  ;;  %2113 = vmatprep.subr.mxu1 %v34_v59 }
  0x23   :  { %2016 = vmatprep.mubr.msk.f32.mxu0 %vm133_vm0, %v76_v34  ;;  %2114 = vmatpush3.msra.mxu1 %v34_v59 }
  0x24   :  { %2062 = vmatmul.mubr.msk.f32.gmra.mxu1 %vm133_vm0, %v107_v40  ;;  %2115 = vmatprep.subr.mxu1 %v33_v0 }
  0x25   :  { %2064 = vmatprep.mubr.msk.f32.mxu1 %vm133_vm0, %v108_v41  ;;  %2116 = vmatpush3.msra.mxu1 %v33_v0  ;;  %v53_v0 = vld [vmem:[%s3280_s5 + $0x38] sm:$0xff] }
  0x26   :  { %2017 = vmatmul.mubr.msk.f32.gmra.mxu0 %vm133_vm0, %v77_v38  ;;  %2117 = vmatprep.subr.mxu1 %v32_v2 }
  0x27   :  { %2019 = vmatprep.mubr.msk.f32.mxu0 %vm133_vm0, %v78_v39  ;;  %2118 = vmatpush3.msra.mxu1 %v32_v2  ;;  %v58_v39 = vld [vmem:[%s3280_s5 + $0x60] sm:$0xff] }
  0x28   :  { %2065 = vmatmul.mubr.msk.f32.gmra.mxu1 %vm133_vm0, %v109_v46  ;;  %2119 = vmatprep.subr.mxu1 %v31_v6 }
  0x29   :  { %2067 = vmatprep.mubr.msk.f32.mxu1 %vm133_vm0, %v110_v47  ;;  %2120 = vmatpush3.msra.mxu1 %v31_v6 }
  0x2a   :  { %2020 = vmatmul.mubr.msk.f32.gmra.mxu0 %vm133_vm0, %v79_v43  ;;  %2121 = vmatprep.subr.mxu1 %v30_v19 }
  0x2b   :  { %2022 = vmatprep.mubr.msk.f32.mxu0 %vm133_vm0, %v80_v45  ;;  %2122 = vmatpush3.msra.mxu1 %v30_v19  ;;  %v57_v45 = vld [vmem:[%s3280_s5 + $0x58] sm:$0xff] }
  0x2c   :  { %2068 = vmatmul.mubr.msk.f32.gmra.mxu1 %vm133_vm0, %v111_v51  ;;  %2219 = vmatprep.subr.mxu0 %v61_v28 }
  0x2d   :  { %2070 = vmatprep.mubr.msk.f32.mxu1 %vm133_vm0, %v112_v52  ;;  %2220 = vmatpush3.msra.mxu0 %v61_v28 }
  0x2e   :  { %2023 = vmatmul.mubr.msk.f32.gmra.mxu0 %vm133_vm0, %v81_v49  ;;  %2221 = vmatprep.subr.mxu0 %v60_v29  ;;  %v56_v49 = vld [vmem:[%s3280_s5 + $0x50] sm:$0xff] }
  0x2f   :  { %2025 = vmatprep.mubr.msk.f32.mxu0 %vm133_vm0, %v82_v50  ;;  %2222 = vmatpush3.msra.mxu0 %v60_v29  ;;  %v47_v29 = vld [vmem:[%s3280_s5 + $0x8] sm:$0xff] }
  0x30   :  { %2071 = vmatmul.mubr.msk.f32.gmra.mxu1 %vm133_vm0, %v113_v57  ;;  %2223 = vmatprep.subr.mxu0 %v59_v35 }
  0x31   :  { %2073 = vmatprep.mubr.msk.f32.mxu1 %vm133_vm0, %v114_v58  ;;  %2224 = vmatpush3.msra.mxu0 %v59_v35  ;;  %v54_v58 = vld [vmem:[%s3280_s5 + $0x40] sm:$0xff] }
  0x32   :  { %2026 = vmatmul.mubr.msk.f32.gmra.mxu0 %vm133_vm0, %v83_v54  ;;  %2225 = vmatprep.subr.mxu0 %v58_v39 }
  0x33   :  { %2028 = vmatprep.mubr.msk.f32.mxu0 %vm133_vm0, %v84_v56  ;;  %2226 = vmatpush3.msra.mxu0 %v58_v39 }
  0x34   :  { %2074 = vmatmul.mubr.msk.f32.gmra.mxu1 %vm133_vm0, %v115_v62  ;;  %2227 = vmatprep.subr.mxu0 %v57_v45 }
  0x35   :  { %2076 = vmatprep.mubr.msk.f32.mxu1 %vm133_vm0, %v116_v63  ;;  %2228 = vmatpush3.msra.mxu0 %v57_v45 }
  0x36   :  { %2029 = vmatmul.mubr.msk.f32.gmra.mxu0 %vm133_vm0, %v85_v60  ;;  %2229 = vmatprep.subr.mxu0 %v56_v49 }
  0x37   :  { %2031 = vmatprep.mubr.msk.f32.mxu0 %vm133_vm0, %v86_v61  ;;  %2230 = vmatpush3.msra.mxu0 %v56_v49 }
  0x38   :  { %2077 = vmatmul.mubr.msk.f32.gmra.mxu1 %vm133_vm0, %v117_v4  ;;  %2231 = vmatprep.subr.mxu0 %v55_v55 }
  0x39   :  { %2079 = vmatprep.mubr.msk.f32.mxu1 %vm133_vm0, %v118_v5  ;;  %2232 = vmatpush3.msra.mxu0 %v55_v55 }
  0x3a   :  { %2032 = vmatmul.mubr.msk.f32.gmra.mxu0 %vm133_vm0, %v87_v1  ;;  %2233 = vmatprep.subr.mxu0 %v54_v58 }
  0x3b   :  { %2034 = vmatprep.mubr.msk.f32.mxu0 %vm133_vm0, %v88_v3  ;;  %2234 = vmatpush3.msra.mxu0 %v54_v58  ;;  %v52_v3 = vld [vmem:[%s3280_s5 + $0x30] sm:$0xff] }
  0x3c   :  { %2080 = vmatmul.mubr.msk.f32.gmra.mxu1 %vm133_vm0, %v119_v9  ;;  %2235 = vmatprep.subr.mxu0 %v53_v0  ;;  %v51_v9 = vld [vmem:[%s3280_s5 + $0x28] sm:$0xff] }
  0x3d   :  { %2082 = vmatprep.mubr.msk.f32.mxu1 %vm133_vm0, %v120_v10  ;;  %2236 = vmatpush3.msra.mxu0 %v53_v0 }
  0x3e   :  { %2035 = vmatmul.mubr.msk.f32.gmra.mxu0 %vm133_vm0, %v89_v7  ;;  %2237 = vmatprep.subr.mxu0 %v52_v3 }
  0x3f   :  { %2037 = vmatprep.mubr.msk.f32.mxu0 %vm133_vm0, %v90_v8  ;;  %2238 = vmatpush3.msra.mxu0 %v52_v3 }
  0x40   :  { %2083 = vmatmul.mubr.msk.f32.gmra.mxu1 %vm133_vm0, %v121_v13  ;;  %2239 = vmatprep.subr.mxu0 %v51_v9 }
  0x41   :  { %2085 = vmatprep.mubr.msk.f32.mxu1 %vm133_vm0, %v122_v14  ;;  %2240 = vmatpush3.msra.mxu0 %v51_v9 }
  0x42   :  { %2038 = vmatmul.mubr.msk.f32.gmra.mxu0 %vm133_vm0, %v91_v11 }
  0x43   :  { %2040 = vmatprep.mubr.msk.f32.mxu0 %vm133_vm0, %v92_v12  ;;  %v50_v12 = vld [vmem:[%s3280_s5 + $0x20] sm:$0xff] }
  0x44   :  { %2086 = vmatmul.mubr.msk.f32.gmra.mxu1 %vm133_vm0, %v123_v16  ;;  %2241 = vmatprep.subr.mxu0 %v50_v12 }
  0x45   :  { %2088 = vmatprep.mubr.msk.f32.mxu1 %vm133_vm0, %v124_v17  ;;  %2242 = vmatpush3.msra.mxu0 %v50_v12 }
  0x46   :  { %2041 = vmatmul.mubr.msk.f32.gmra.mxu0 %vm133_vm0, %v93_v15 }
  0x48   :  { %2089 = vmatmul.mubr.msk.f32.gmra.mxu1 %vm133_vm0, %v125_v18  ;;  %v49_v18 = vld [vmem:[%s3280_s5 + $0x18] sm:$0xff] }
  0x49   :  { %2243 = vmatprep.subr.mxu0 %v49_v18 }
  0x4a   :  { %2244 = vmatpush3.msra.mxu0 %v49_v18 }
  0xca   :  { %v1997_v21 = vpop.f32.mrf.mxu0 }
  0xcb   :  { %v398_v22 = vadd.f32 %v1997_v21, %v2714_v20 }
  0xcc   :  { %v392_v23 = vpop.f32.mrf.mxu0  ;;  %v2718_v27 = vpop.f32.mrf.mxu1 }
  0xcd   :  { %v393_v24 = vadd.f32 %v2714_v20, %v392_v23  ;;  %v712_v30 = vmax.f32 %v398_v22, 0.0  ;;  %v48_v22 = vld [vmem:[%s3280_s5 + $0x10] sm:$0xff] }
  0xce   :  { %v2000_v25 = vpop.f32.mrf.mxu0  ;;  %v2728_v34 = vpop.f32.mrf.mxu1  ;;  %2245 = vmatprep.subr.mxu0 %v48_v22 }
  0xcf   :  { %v711_v26 = vmax.f32 %v393_v24, 0.0  ;;  %v408_v31 = vadd.f32 %v2000_v25, %v2714_v20  ;;  %2246 = vmatpush3.msra.mxu0 %v48_v22 }
  0xd0   :  { %v402_v32 = vpop.f32.mrf.mxu0  ;;  %v2733_v38 = vpop.f32.mrf.mxu1  ;;  %2247 = vmatprep.subr.mxu0 %v47_v29 }
  0xd1   :  { %v403_v33 = vadd.f32 %v2714_v20, %v402_v32  ;;  %2123 = vmatprep.mubr.f32.mxu1 %v711_v26  ;;  %v714_v40 = vmax.f32 %v408_v31, 0.0  ;;  %2248 = vmatpush3.msra.mxu0 %v47_v29 }
  0xd2   :  { %v2003_v36 = vpop.f32.mrf.mxu0  ;;  %2124 = vmatmul.mubr.f32.vlgmr.msra.gmra.mxu1 %v712_v30  ;;  %v2740_v44 = vpop.f32.mrf.mxu1 }
  0xd3   :  { %v713_v37 = vmax.f32 %v403_v33, 0.0  ;;  %v418_v41 = vadd.f32 %v2003_v36, %v2714_v20 }
  0xd4   :  { %v412_v42 = vpop.f32.mrf.mxu0  ;;  %v2745_v48 = vpop.f32.mrf.mxu1 }
  0xd5   :  { %v413_v43 = vadd.f32 %v2714_v20, %v412_v42  ;;  %2126 = vmatprep.mubr.f32.mxu1 %v713_v37  ;;  %v716_v50 = vmax.f32 %v418_v41, 0.0 }
  0xd6   :  { %v2006_v46 = vpop.f32.mrf.mxu0  ;;  %2127 = vmatmul.mubr.f32.gmra.mxu1 %v714_v40  ;;  %v2752_v54 = vpop.f32.mrf.mxu1 }
  0xd7   :  { %v715_v47 = vmax.f32 %v413_v43, 0.0  ;;  %v428_v51 = vadd.f32 %v2006_v46, %v2714_v20 }
  0xd8   :  { %v422_v52 = vpop.f32.mrf.mxu0  ;;  %v2761_v62 = vpop.f32.mrf.mxu1 }
  0xd9   :  { %v423_v53 = vadd.f32 %v2714_v20, %v422_v52  ;;  %2129 = vmatprep.mubr.f32.mxu1 %v715_v47  ;;  %v718_v59 = vmax.f32 %v428_v51, 0.0 }
  0xda   :  { %v2009_v56 = vpop.f32.mrf.mxu0  ;;  %2130 = vmatmul.mubr.f32.gmra.mxu1 %v716_v50  ;;  %v2771_v7 = vpop.f32.mrf.mxu1 }
  0xdb   :  { %v717_v57 = vmax.f32 %v423_v53, 0.0  ;;  %v438_v60 = vadd.f32 %v2009_v56, %v2714_v20 }
  0xdc   :  { %v432_v61 = vpop.f32.mrf.mxu0  ;;  %v2781_v16 = vpop.f32.mrf.mxu1 }
  0xdd   :  { %v433_v63 = vadd.f32 %v2714_v20, %v432_v61  ;;  %2132 = vmatprep.mubr.f32.mxu1 %v717_v57  ;;  %v720_v4 = vmax.f32 %v438_v60, 0.0 }
  0xde   :  { %v2012_v1 = vpop.f32.mrf.mxu0  ;;  %2133 = vmatmul.mubr.f32.gmra.mxu1 %v718_v59  ;;  %v2791_v26 = vpop.f32.mrf.mxu1 }
  0xdf   :  { %v719_v2 = vmax.f32 %v433_v63, 0.0  ;;  %v448_v5 = vadd.f32 %v2012_v1, %v2714_v20 }
  0xe0   :  { %v442_v6 = vpop.f32.mrf.mxu0  ;;  %v2798_v36 = vpop.f32.mrf.mxu1 }
  0xe1   :  { %v443_v8 = vadd.f32 %v2714_v20, %v442_v6  ;;  %2135 = vmatprep.mubr.f32.mxu1 %v719_v2  ;;  %v722_v13 = vmax.f32 %v448_v5, 0.0 }
  0xe2   :  { %v2015_v10 = vpop.f32.mrf.mxu0  ;;  %2136 = vmatmul.mubr.f32.gmra.mxu1 %v720_v4  ;;  %v2802_v45 = vpop.f32.mrf.mxu1 }
  0xe3   :  { %v721_v11 = vmax.f32 %v443_v8, 0.0  ;;  %v458_v14 = vadd.f32 %v2015_v10, %v2714_v20 }
  0xe4   :  { %v452_v15 = vpop.f32.mrf.mxu0  ;;  %v2806_v53 = vpop.f32.mrf.mxu1 }
  0xe5   :  { %v453_v17 = vadd.f32 %v2714_v20, %v452_v15  ;;  %2138 = vmatprep.mubr.f32.mxu1 %v721_v11  ;;  %v724_v23 = vmax.f32 %v458_v14, 0.0 }
  0xe6   :  { %v2018_v19 = vpop.f32.mrf.mxu0  ;;  %2139 = vmatmul.mubr.f32.gmra.mxu1 %v722_v13  ;;  %v2810_v61 = vpop.f32.mrf.mxu1 }
  0xe7   :  { %v723_v21 = vmax.f32 %v453_v17, 0.0  ;;  %v468_v24 = vadd.f32 %v2018_v19, %v2714_v20 }
  0xe8   :  { %v462_v25 = vpop.f32.mrf.mxu0  ;;  %v2814_v5 = vpop.f32.mrf.mxu1 }
  0xe9   :  { %v463_v28 = vadd.f32 %v2714_v20, %v462_v25  ;;  %2141 = vmatprep.mubr.f32.mxu1 %v723_v21  ;;  %v726_v32 = vmax.f32 %v468_v24, 0.0 }
  0xea   :  { %v2021_v30 = vpop.f32.mrf.mxu0  ;;  %2142 = vmatmul.mubr.f32.gmra.mxu1 %v724_v23  ;;  %v2818_v13 = vpop.f32.mrf.mxu1 }
  0xeb   :  { %v725_v31 = vmax.f32 %v463_v28, 0.0  ;;  %v478_v33 = vadd.f32 %v2021_v30, %v2714_v20  ;;  %v553_v28 = vadd.f32 %v2714_v20, %v2728_v34 }
  0xec   :  { %v472_v35 = vpop.f32.mrf.mxu0  ;;  %v2822_v22 = vpop.f32.mrf.mxu1 }
  0xed   :  { %v473_v37 = vadd.f32 %v2714_v20, %v472_v35  ;;  %2144 = vmatprep.mubr.f32.mxu1 %v725_v31  ;;  %v728_v41 = vmax.f32 %v478_v33, 0.0 }
  0xee   :  { %v2024_v39 = vpop.f32.mrf.mxu0  ;;  %2145 = vmatmul.mubr.f32.gmra.mxu1 %v726_v32  ;;  %v632_v32 = vpop.f32.mrf.mxu1 }
  0xef   :  { %v727_v40 = vmax.f32 %v473_v37, 0.0  ;;  %v488_v42 = vadd.f32 %v2024_v39, %v2714_v20  ;;  %v743_v37 = vmax.f32 %v553_v28, 0.0  ;;  %v563_v39 = vadd.f32 %v2714_v20, %v2740_v44 }
  0xf0   :  { %v482_v43 = vpop.f32.mrf.mxu0 }
  0xf1   :  { %v483_v46 = vadd.f32 %v2714_v20, %v482_v43  ;;  %2147 = vmatprep.mubr.f32.mxu1 %v727_v40  ;;  %v730_v50 = vmax.f32 %v488_v42, 0.0  ;;  %v2833_v42 = vpop.f32.mrf.mxu1  ;;  %v745_v34 = vmax.f32 %v563_v39, 0.0  ;;  %v573_v43 = vadd.f32 %v2714_v20, %v2752_v54 }
  0xf2   :  { %v2027_v47 = vpop.f32.mrf.mxu0  ;;  %2148 = vmatmul.mubr.f32.gmra.mxu1 %v728_v41  ;;  %v558_v41 = vadd.f32 %v2718_v27, %v2714_v20  ;;  %v583_v27 = vadd.f32 %v2714_v20, %v2771_v7  ;;  %v593_v54 = vadd.f32 %v2714_v20, %v2791_v26  ;;  %v598_v26 = vadd.f32 %v2781_v16, %v2714_v20 }
  0xf3   :  { %v729_v49 = vmax.f32 %v483_v46, 0.0  ;;  %v498_v51 = vadd.f32 %v2027_v47, %v2714_v20  ;;  %v568_v47 = vadd.f32 %v2733_v38, %v2714_v20  ;;  %v747_v44 = vmax.f32 %v573_v43, 0.0  ;;  %v46_v38 = vld [vmem:[%s3280_s5] sm:$0xff] }
  0xf4   :  { %v492_v52 = vpop.f32.mrf.mxu0  ;;  %v744_v46 = vmax.f32 %v558_v41, 0.0  ;;  %2249 = vmatprep.subr.mxu0 %v46_v38  ;;  %v618_v16 = vadd.f32 %v2806_v53, %v2714_v20  ;;  %v638_v53 = vadd.f32 %v2822_v22, %v2714_v20 }
  0xf5   :  { %v493_v55 = vadd.f32 %v2714_v20, %v492_v52  ;;  %2150 = vmatprep.mubr.f32.mxu1 %v729_v49  ;;  %v732_v58 = vmax.f32 %v498_v51, 0.0  ;;  %v642_v49 = vpop.f32.mrf.mxu1  ;;  %v578_v51 = vadd.f32 %v2745_v48, %v2714_v20  ;;  %2250 = vmatpush3.msra.mxu0 %v46_v38  ;;  %v751_v48 = vmax.f32 %v593_v54, 0.0  ;;  %v2885_v54 = vld [vmem:[%s3281_s4] ss:$0 sm:$0xff] }
  0xf6   :  { %v2030_v56 = vpop.f32.mrf.mxu0  ;;  %2151 = vmatmul.mubr.f32.gmra.mxu1 %v730_v50  ;;  %v746_v50 = vmax.f32 %v568_v47, 0.0 }
  0xf7   :  { %v731_v57 = vmax.f32 %v493_v55, 0.0  ;;  %v508_v59 = vadd.f32 %v2030_v56, %v2714_v20  ;;  %v2075_v52 = vpop.f32.mrf.mxu1  ;;  %v749_v55 = vmax.f32 %v583_v27, 0.0  ;;  %v748_v56 = vmax.f32 %v578_v51, 0.0 }
  0xf8   :  { %v502_v60 = vpop.f32.mrf.mxu0 }
  0xf9   :  { %v503_v63 = vadd.f32 %v2714_v20, %v502_v60  ;;  %2153 = vmatprep.mubr.f32.mxu1 %v731_v57  ;;  %v734_v2 = vmax.f32 %v508_v59, 0.0  ;;  %v588_v57 = vadd.f32 %v2761_v62, %v2714_v20  ;;  %v652_v7 = vpop.f32.mrf.mxu1  ;;  %v613_v62 = vadd.f32 %v2714_v20, %v2810_v61 }
  0xfa   :  { %v2033_v0 = vpop.f32.mrf.mxu0  ;;  %2154 = vmatmul.mubr.f32.gmra.mxu1 %v732_v58  ;;  %v603_v58 = vadd.f32 %v2714_v20, %v2802_v45  ;;  %v623_v45 = vadd.f32 %v2714_v20, %v2818_v13  ;;  %v633_v61 = vadd.f32 %v2714_v20, %v632_v32 }
  0xfb   :  { %v733_v1 = vmax.f32 %v503_v63, 0.0  ;;  %v518_v3 = vadd.f32 %v2033_v0, %v2714_v20  ;;  %v750_v59 = vmax.f32 %v588_v57, 0.0  ;;  %v2078_v60 = vpop.f32.mrf.mxu1  ;;  %v752_v0 = vmax.f32 %v598_v26, 0.0 }
  0xfc   :  { %v512_v4 = vpop.f32.mrf.mxu0  ;;  %v753_v63 = vmax.f32 %v603_v58, 0.0 }
  0xfd   :  { %v513_v6 = vadd.f32 %v2714_v20, %v512_v4  ;;  %2156 = vmatprep.mubr.f32.mxu1 %v733_v1  ;;  %v736_v10 = vmax.f32 %v518_v3, 0.0  ;;  %v608_v1 = vadd.f32 %v2798_v36, %v2714_v20  ;;  %v755_v3 = vmax.f32 %v613_v62, 0.0 }
  0xfe   :  { %v2036_v8 = vpop.f32.mrf.mxu0  ;;  %2157 = vmatmul.mubr.f32.gmra.mxu1 %v734_v2  ;;  %v662_v2 = vpop.f32.mrf.mxu1  ;;  %v628_v36 = vadd.f32 %v2814_v5, %v2714_v20  ;;  %v648_v5 = vadd.f32 %v2833_v42, %v2714_v20 }
  0xff   :  { %v735_v9 = vmax.f32 %v513_v6, 0.0  ;;  %v528_v11 = vadd.f32 %v2036_v8, %v2714_v20  ;;  %v754_v4 = vmax.f32 %v608_v1, 0.0  ;;  %v757_v8 = vmax.f32 %v623_v45, 0.0 }
 0x100   :  { %v522_v12 = vpop.f32.mrf.mxu0  ;;  %v2081_v6 = vpop.f32.mrf.mxu1  ;;  %v758_v13 = vmax.f32 %v628_v36, 0.0 }
 0x101   :  { %v523_v14 = vadd.f32 %v2714_v20, %v522_v12  ;;  %2159 = vmatprep.mubr.f32.mxu1 %v735_v9  ;;  %v738_v18 = vmax.f32 %v528_v11, 0.0  ;;  %v756_v9 = vmax.f32 %v618_v16, 0.0  ;;  %v759_v11 = vmax.f32 %v633_v61, 0.0 }
 0x102   :  { %v2039_v15 = vpop.f32.mrf.mxu0  ;;  %2160 = vmatmul.mubr.f32.gmra.mxu1 %v736_v10  ;;  %v672_v10 = vpop.f32.mrf.mxu1  ;;  %v643_v12 = vadd.f32 %v2714_v20, %v642_v49  ;;  %v678_v39 = vadd.f32 %v2081_v6, %v2714_v20 }
 0x103   :  { %v737_v17 = vmax.f32 %v523_v14, 0.0  ;;  %v538_v19 = vadd.f32 %v2039_v15, %v2714_v20 }
 0x104   :  { %v532_v21 = vpop.f32.mrf.mxu0  ;;  %v2084_v14 = vpop.f32.mrf.mxu1  ;;  %v761_v15 = vmax.f32 %v643_v12, 0.0 }
 0x105   :  { %v533_v23 = vadd.f32 %v2714_v20, %v532_v21  ;;  %2162 = vmatprep.mubr.f32.mxu1 %v737_v17  ;;  %v740_v29 = vmax.f32 %v538_v19, 0.0  ;;  %v653_v17 = vadd.f32 %v2714_v20, %v652_v7  ;;  %v688_v43 = vadd.f32 %v2084_v14, %v2714_v20 }
 0x106   :  { %v2042_v24 = vpop.f32.mrf.mxu0  ;;  %2163 = vmatmul.mubr.f32.gmra.mxu1 %v738_v18  ;;  %v760_v18 = vmax.f32 %v638_v53, 0.0  ;;  %v682_v19 = vpop.f32.mrf.mxu1 }
 0x107   :  { %v739_v25 = vmax.f32 %v533_v23, 0.0  ;;  %v548_v30 = vadd.f32 %v2042_v24, %v2714_v20  ;;  %v763_v21 = vmax.f32 %v653_v17, 0.0  ;;  %v663_v23 = vadd.f32 %v2714_v20, %v662_v2 }
 0x108   :  { %v542_v31 = vpop.f32.mrf.mxu0  ;;  %v762_v24 = vmax.f32 %v648_v5, 0.0  ;;  %v2087_v22 = vpop.f32.mrf.mxu1 }
 0x109   :  { %v543_v33 = vadd.f32 %v2714_v20, %v542_v31  ;;  %2165 = vmatprep.mubr.f32.mxu1 %v739_v25  ;;  %v742_v40 = vmax.f32 %v548_v30, 0.0  ;;  %v658_v25 = vadd.f32 %v2075_v52, %v2714_v20  ;;  %v765_v28 = vmax.f32 %v663_v23, 0.0 }
 0x10a   :  { %2166 = vmatmul.mubr.f32.gmra.mxu1 %v740_v29  ;;  %v673_v29 = vadd.f32 %v2714_v20, %v672_v10  ;;  %v668_v31 = vadd.f32 %v2078_v60, %v2714_v20  ;;  %v692_v32 = vpop.f32.mrf.mxu1  ;;  %v698_v27 = vadd.f32 %v2087_v22, %v2714_v20 }
 0x10b   :  { %v741_v35 = vmax.f32 %v543_v33, 0.0  ;;  %v764_v30 = vmax.f32 %v658_v25, 0.0  ;;  %v693_v42 = vadd.f32 %v2714_v20, %v692_v32 }
 0x10c   :  { %v767_v33 = vmax.f32 %v673_v29, 0.0  ;;  %v772_v51 = vmax.f32 %v698_v27, 0.0 }
 0x10d   :  { %2168 = vmatprep.mubr.f32.mxu1 %v741_v35  ;;  %v683_v35 = vadd.f32 %v2714_v20, %v682_v19  ;;  %v771_v47 = vmax.f32 %v693_v42, 0.0 }
 0x10e   :  { %2169 = vmatmul.mubr.f32.gmra.mxu1 %v742_v40  ;;  %v2090_v40 = vpop.f32.mrf.mxu1 }
 0x10f   :  { %2171 = vmatprep.mubr.f32.mxu1 %v743_v37  ;;  %v766_v37 = vmax.f32 %v668_v31, 0.0  ;;  %v769_v41 = vmax.f32 %v683_v35, 0.0  ;;  %v708_v52 = vadd.f32 %v2090_v40, %v2714_v20 }
 0x112   :  { %2172 = vmatmul.mubr.f32.gmra.mxu1 %v744_v46  ;;  %v702_v46 = vpop.f32.mrf.mxu1 }
 0x113   :  { %2174 = vmatprep.mubr.f32.mxu1 %v745_v34  ;;  %v768_v34 = vmax.f32 %v678_v39, 0.0  ;;  %v703_v49 = vadd.f32 %v2714_v20, %v702_v46 }
 0x116   :  { %2175 = vmatmul.mubr.f32.gmra.mxu1 %v746_v50  ;;  %v773_v50 = vmax.f32 %v703_v49, 0.0 }
 0x117   :  { %2177 = vmatprep.mubr.f32.mxu1 %v747_v44  ;;  %v770_v44 = vmax.f32 %v688_v43, 0.0 }
 0x11a   :  { %2178 = vmatmul.mubr.f32.gmra.mxu1 %v748_v56 }
 0x11b   :  { %2180 = vmatprep.mubr.f32.mxu1 %v749_v55  ;;  %v774_v55 = vmax.f32 %v708_v52, 0.0 }
 0x11e   :  { %2181 = vmatmul.mubr.f32.gmra.mxu1 %v750_v59 }
 0x11f   :  { %2183 = vmatprep.mubr.f32.mxu1 %v751_v48 }
 0x122   :  { %2184 = vmatmul.mubr.f32.gmra.mxu1 %v752_v0 }
 0x123   :  { %2186 = vmatprep.mubr.f32.mxu1 %v753_v63 }
 0x126   :  { %2187 = vmatmul.mubr.f32.gmra.mxu1 %v754_v4 }
 0x127   :  { %2189 = vmatprep.mubr.f32.mxu1 %v755_v3 }
 0x12a   :  { %2190 = vmatmul.mubr.f32.gmra.mxu1 %v756_v9 }
 0x12b   :  { %2192 = vmatprep.mubr.f32.mxu1 %v757_v8 }
 0x12e   :  { %2193 = vmatmul.mubr.f32.gmra.mxu1 %v758_v13 }
 0x12f   :  { %2195 = vmatprep.mubr.f32.mxu1 %v759_v11 }
 0x132   :  { %2196 = vmatmul.mubr.f32.gmra.mxu1 %v760_v18 }
 0x133   :  { %2198 = vmatprep.mubr.f32.mxu1 %v761_v15 }
 0x136   :  { %2199 = vmatmul.mubr.f32.gmra.mxu1 %v762_v24 }
 0x137   :  { %2201 = vmatprep.mubr.f32.mxu1 %v763_v21 }
 0x13a   :  { %2202 = vmatmul.mubr.f32.gmra.mxu1 %v764_v30 }
 0x13b   :  { %2204 = vmatprep.mubr.f32.mxu1 %v765_v28 }
 0x13e   :  { %2205 = vmatmul.mubr.f32.gmra.mxu1 %v766_v37 }
 0x13f   :  { %2207 = vmatprep.mubr.f32.mxu1 %v767_v33 }
 0x142   :  { %2208 = vmatmul.mubr.f32.gmra.mxu1 %v768_v34 }
 0x143   :  { %2210 = vmatprep.mubr.f32.mxu1 %v769_v41 }
 0x146   :  { %2211 = vmatmul.mubr.f32.gmra.mxu1 %v770_v44 }
 0x147   :  { %2213 = vmatprep.mubr.f32.mxu1 %v771_v47 }
 0x14a   :  { %2214 = vmatmul.mubr.f32.gmra.mxu1 %v772_v51 }
 0x14b   :  { %2216 = vmatprep.mubr.f32.mxu1 %v773_v50 }
 0x14e   :  { %2217 = vmatmul.mubr.f32.gmra.mxu1 %v774_v55 }
 0x192   :  { %v2125_v38 = vpop.f32.mrf.mxu1 }
 0x193   :  { %v854_v56 = vadd.f32 %v2125_v38, %v2885_v54 }
 0x194   :  { %v848_v57 = vpop.f32.mrf.mxu1 }
 0x195   :  { %v849_v7 = vadd.f32 %v2885_v54, %v848_v57  ;;  %v1168_v59 = vmax.f32 %v854_v56, 0.0 }
 0x196   :  { %v2128_v48 = vpop.f32.mrf.mxu1 }
 0x197   :  { %v1167_v58 = vmax.f32 %v849_v7, 0.0  ;;  %v864_v20 = vadd.f32 %v2128_v48, %v2885_v54 }
 0x198   :  { %v858_v26 = vpop.f32.mrf.mxu1 }
 0x199   :  { %v859_v60 = vadd.f32 %v2885_v54, %v858_v26  ;;  %2251 = vmatprep.mubr.f32.mxu0 %v1167_v58  ;;  %v1170_v0 = vmax.f32 %v864_v20, 0.0 }
 0x19a   :  { %v2131_v63 = vpop.f32.mrf.mxu1  ;;  %2252 = vmatmul.mubr.f32.vlgmr.msra.gmra.mxu0 %v1168_v59 }
 0x19b   :  { %v1169_v62 = vmax.f32 %v859_v60, 0.0  ;;  %v874_v1 = vadd.f32 %v2131_v63, %v2885_v54 }
 0x19c   :  { %v868_v2 = vpop.f32.mrf.mxu1 }
 0x19d   :  { %v869_v3 = vadd.f32 %v2885_v54, %v868_v2  ;;  %2254 = vmatprep.mubr.f32.mxu0 %v1169_v62  ;;  %v1172_v16 = vmax.f32 %v874_v1, 0.0 }
 0x19e   :  { %v2134_v45 = vpop.f32.mrf.mxu1  ;;  %2255 = vmatmul.mubr.f32.gmra.mxu0 %v1170_v0 }
 0x19f   :  { %v1171_v4 = vmax.f32 %v869_v3, 0.0  ;;  %v884_v6 = vadd.f32 %v2134_v45, %v2885_v54 }
 0x1a0   :  { %v878_v8 = vpop.f32.mrf.mxu1 }
 0x1a1   :  { %v879_v61 = vadd.f32 %v2885_v54, %v878_v8  ;;  %2257 = vmatprep.mubr.f32.mxu0 %v1171_v4  ;;  %v1174_v10 = vmax.f32 %v884_v6, 0.0 }
 0x1a2   :  { %v2137_v9 = vpop.f32.mrf.mxu1  ;;  %2258 = vmatmul.mubr.f32.gmra.mxu0 %v1172_v16 }
 0x1a3   :  { %v1173_v36 = vmax.f32 %v879_v61, 0.0  ;;  %v894_v11 = vadd.f32 %v2137_v9, %v2885_v54 }
 0x1a4   :  { %v888_v12 = vpop.f32.mrf.mxu1 }
 0x1a5   :  { %v889_v13 = vadd.f32 %v2885_v54, %v888_v12  ;;  %2260 = vmatprep.mubr.f32.mxu0 %v1173_v36  ;;  %v1176_v15 = vmax.f32 %v894_v11, 0.0 }
 0x1a6   :  { %v2140_v53 = vpop.f32.mrf.mxu1  ;;  %2261 = vmatmul.mubr.f32.gmra.mxu0 %v1174_v10 }
 0x1a7   :  { %v1175_v14 = vmax.f32 %v889_v13, 0.0  ;;  %v904_v17 = vadd.f32 %v2140_v53, %v2885_v54 }
 0x1a8   :  { %v898_v18 = vpop.f32.mrf.mxu1 }
 0x1a9   :  { %v899_v5 = vadd.f32 %v2885_v54, %v898_v18  ;;  %2263 = vmatprep.mubr.f32.mxu0 %v1175_v14  ;;  %v1178_v23 = vmax.f32 %v904_v17, 0.0 }
 0x1aa   :  { %v2143_v19 = vpop.f32.mrf.mxu1  ;;  %2264 = vmatmul.mubr.f32.gmra.mxu0 %v1176_v15 }
 0x1ab   :  { %v1177_v21 = vmax.f32 %v899_v5, 0.0  ;;  %v914_v24 = vadd.f32 %v2143_v19, %v2885_v54 }
 0x1ac   :  { %v908_v25 = vpop.f32.mrf.mxu1 }
 0x1ad   :  { %v909_v22 = vadd.f32 %v2885_v54, %v908_v25  ;;  %2266 = vmatprep.mubr.f32.mxu0 %v1177_v21  ;;  %v1180_v30 = vmax.f32 %v914_v24, 0.0 }
 0x1ae   :  { %v2146_v28 = vpop.f32.mrf.mxu1  ;;  %2267 = vmatmul.mubr.f32.gmra.mxu0 %v1178_v23 }
 0x1af   :  { %v1179_v29 = vmax.f32 %v909_v22, 0.0  ;;  %v924_v31 = vadd.f32 %v2146_v28, %v2885_v54 }
 0x1b0   :  { %v918_v32 = vpop.f32.mrf.mxu1 }
 0x1b1   :  { %v919_v33 = vadd.f32 %v2885_v54, %v918_v32  ;;  %2269 = vmatprep.mubr.f32.mxu0 %v1179_v29  ;;  %v1182_v39 = vmax.f32 %v924_v31, 0.0 }
 0x1b2   :  { %v2149_v35 = vpop.f32.mrf.mxu1  ;;  %2270 = vmatmul.mubr.f32.gmra.mxu0 %v1180_v30 }
 0x1b3   :  { %v1181_v37 = vmax.f32 %v919_v33, 0.0  ;;  %v934_v40 = vadd.f32 %v2149_v35, %v2885_v54 }
 0x1b4   :  { %v928_v41 = vpop.f32.mrf.mxu1 }
 0x1b5   :  { %v929_v42 = vadd.f32 %v2885_v54, %v928_v41  ;;  %2272 = vmatprep.mubr.f32.mxu0 %v1181_v37  ;;  %v1184_v46 = vmax.f32 %v934_v40, 0.0 }
 0x1b6   :  { %v2152_v34 = vpop.f32.mrf.mxu1  ;;  %2273 = vmatmul.mubr.f32.gmra.mxu0 %v1182_v39 }
 0x1b7   :  { %v1183_v43 = vmax.f32 %v929_v42, 0.0  ;;  %v944_v47 = vadd.f32 %v2152_v34, %v2885_v54 }
 0x1b8   :  { %v938_v49 = vpop.f32.mrf.mxu1 }
 0x1b9   :  { %v939_v44 = vadd.f32 %v2885_v54, %v938_v49  ;;  %2275 = vmatprep.mubr.f32.mxu0 %v1183_v43  ;;  %v1186_v51 = vmax.f32 %v944_v47, 0.0 }
 0x1ba   :  { %v2155_v27 = vpop.f32.mrf.mxu1  ;;  %2276 = vmatmul.mubr.f32.gmra.mxu0 %v1184_v46 }
 0x1bb   :  { %v1185_v50 = vmax.f32 %v939_v44, 0.0  ;;  %v954_v52 = vadd.f32 %v2155_v27, %v2885_v54 }
 0x1bc   :  { %v948_v55 = vpop.f32.mrf.mxu1 }
 0x1bd   :  { %v949_v38 = vadd.f32 %v2885_v54, %v948_v55  ;;  %2278 = vmatprep.mubr.f32.mxu0 %v1185_v50  ;;  %v1188_v7 = vmax.f32 %v954_v52, 0.0 }
 0x1be   :  { %v2158_v56 = vpop.f32.mrf.mxu1  ;;  %2279 = vmatmul.mubr.f32.gmra.mxu0 %v1186_v51 }
 0x1bf   :  { %v1187_v57 = vmax.f32 %v949_v38, 0.0  ;;  %v964_v48 = vadd.f32 %v2158_v56, %v2885_v54 }
 0x1c0   :  { %v958_v58 = vpop.f32.mrf.mxu1 }
 0x1c1   :  { %v959_v59 = vadd.f32 %v2885_v54, %v958_v58  ;;  %2281 = vmatprep.mubr.f32.mxu0 %v1187_v57  ;;  %v1190_v60 = vmax.f32 %v964_v48, 0.0 }
 0x1c2   :  { %v2161_v20 = vpop.f32.mrf.mxu1  ;;  %2282 = vmatmul.mubr.f32.gmra.mxu0 %v1188_v7 }
 0x1c3   :  { %v1189_v26 = vmax.f32 %v959_v59, 0.0  ;;  %v974_v63 = vadd.f32 %v2161_v20, %v2885_v54 }
 0x1c4   :  { %v968_v62 = vpop.f32.mrf.mxu1 }
 0x1c5   :  { %v969_v0 = vadd.f32 %v2885_v54, %v968_v62  ;;  %2284 = vmatprep.mubr.f32.mxu0 %v1189_v26  ;;  %v1192_v3 = vmax.f32 %v974_v63, 0.0 }
 0x1c6   :  { %v2164_v1 = vpop.f32.mrf.mxu1  ;;  %2285 = vmatmul.mubr.f32.gmra.mxu0 %v1190_v60 }
 0x1c7   :  { %v1191_v2 = vmax.f32 %v969_v0, 0.0  ;;  %v984_v45 = vadd.f32 %v2164_v1, %v2885_v54 }
 0x1c8   :  { %v978_v4 = vpop.f32.mrf.mxu1 }
 0x1c9   :  { %v979_v16 = vadd.f32 %v2885_v54, %v978_v4  ;;  %2287 = vmatprep.mubr.f32.mxu0 %v1191_v2  ;;  %v1194_v61 = vmax.f32 %v984_v45, 0.0 }
 0x1ca   :  { %v2167_v6 = vpop.f32.mrf.mxu1  ;;  %2288 = vmatmul.mubr.f32.gmra.mxu0 %v1192_v3 }
 0x1cb   :  { %v1193_v8 = vmax.f32 %v979_v16, 0.0  ;;  %v994_v9 = vadd.f32 %v2167_v6, %v2885_v54 }
 0x1cc   :  { %v988_v36 = vpop.f32.mrf.mxu1 }
 0x1cd   :  { %v989_v10 = vadd.f32 %v2885_v54, %v988_v36  ;;  %2290 = vmatprep.mubr.f32.mxu0 %v1193_v8  ;;  %v1196_v13 = vmax.f32 %v994_v9, 0.0 }
 0x1ce   :  { %v2170_v11 = vpop.f32.mrf.mxu1  ;;  %2291 = vmatmul.mubr.f32.gmra.mxu0 %v1194_v61 }
 0x1cf   :  { %v1195_v12 = vmax.f32 %v989_v10, 0.0  ;;  %v1004_v53 = vadd.f32 %v2170_v11, %v2885_v54 }
 0x1d0   :  { %v998_v14 = vpop.f32.mrf.mxu1 }
 0x1d1   :  { %v999_v15 = vadd.f32 %v2885_v54, %v998_v14  ;;  %2293 = vmatprep.mubr.f32.mxu0 %v1195_v12  ;;  %v1198_v5 = vmax.f32 %v1004_v53, 0.0 }
 0x1d2   :  { %v2173_v17 = vpop.f32.mrf.mxu1  ;;  %2294 = vmatmul.mubr.f32.gmra.mxu0 %v1196_v13 }
 0x1d3   :  { %v1197_v18 = vmax.f32 %v999_v15, 0.0  ;;  %v1014_v19 = vadd.f32 %v2173_v17, %v2885_v54 }
 0x1d4   :  { %v1008_v21 = vpop.f32.mrf.mxu1 }
 0x1d5   :  { %v1009_v23 = vadd.f32 %v2885_v54, %v1008_v21  ;;  %2296 = vmatprep.mubr.f32.mxu0 %v1197_v18  ;;  %v1200_v22 = vmax.f32 %v1014_v19, 0.0 }
 0x1d6   :  { %v2176_v24 = vpop.f32.mrf.mxu1  ;;  %2297 = vmatmul.mubr.f32.gmra.mxu0 %v1198_v5 }
 0x1d7   :  { %v1199_v25 = vmax.f32 %v1009_v23, 0.0  ;;  %v1024_v28 = vadd.f32 %v2176_v24, %v2885_v54 }
 0x1d8   :  { %v1018_v29 = vpop.f32.mrf.mxu1 }
 0x1d9   :  { %v1019_v30 = vadd.f32 %v2885_v54, %v1018_v29  ;;  %2299 = vmatprep.mubr.f32.mxu0 %v1199_v25  ;;  %v1202_v33 = vmax.f32 %v1024_v28, 0.0 }
 0x1da   :  { %v2179_v31 = vpop.f32.mrf.mxu1  ;;  %2300 = vmatmul.mubr.f32.gmra.mxu0 %v1200_v22 }
 0x1db   :  { %v1201_v32 = vmax.f32 %v1019_v30, 0.0  ;;  %v1034_v35 = vadd.f32 %v2179_v31, %v2885_v54 }
 0x1dc   :  { %v1028_v37 = vpop.f32.mrf.mxu1 }
 0x1dd   :  { %v1029_v39 = vadd.f32 %v2885_v54, %v1028_v37  ;;  %2302 = vmatprep.mubr.f32.mxu0 %v1201_v32  ;;  %v1204_v42 = vmax.f32 %v1034_v35, 0.0 }
 0x1de   :  { %v2182_v40 = vpop.f32.mrf.mxu1  ;;  %2303 = vmatmul.mubr.f32.gmra.mxu0 %v1202_v33 }
 0x1df   :  { %v1203_v41 = vmax.f32 %v1029_v39, 0.0  ;;  %v1044_v34 = vadd.f32 %v2182_v40, %v2885_v54 }
 0x1e0   :  { %v1038_v43 = vpop.f32.mrf.mxu1 }
 0x1e1   :  { %v1039_v46 = vadd.f32 %v2885_v54, %v1038_v43  ;;  %2305 = vmatprep.mubr.f32.mxu0 %v1203_v41  ;;  %v1206_v44 = vmax.f32 %v1044_v34, 0.0 }
 0x1e2   :  { %v2185_v47 = vpop.f32.mrf.mxu1  ;;  %2306 = vmatmul.mubr.f32.gmra.mxu0 %v1204_v42 }
 0x1e3   :  { %v1205_v49 = vmax.f32 %v1039_v46, 0.0  ;;  %v1054_v27 = vadd.f32 %v2185_v47, %v2885_v54 }
 0x1e4   :  { %v1048_v50 = vpop.f32.mrf.mxu1 }
 0x1e5   :  { %v1049_v51 = vadd.f32 %v2885_v54, %v1048_v50  ;;  %2308 = vmatprep.mubr.f32.mxu0 %v1205_v49  ;;  %v1208_v38 = vmax.f32 %v1054_v27, 0.0 }
 0x1e6   :  { %v2188_v52 = vpop.f32.mrf.mxu1  ;;  %2309 = vmatmul.mubr.f32.gmra.mxu0 %v1206_v44 }
 0x1e7   :  { %v1207_v55 = vmax.f32 %v1049_v51, 0.0  ;;  %v1064_v56 = vadd.f32 %v2188_v52, %v2885_v54 }
 0x1e8   :  { %v1058_v57 = vpop.f32.mrf.mxu1 }
 0x1e9   :  { %v1059_v7 = vadd.f32 %v2885_v54, %v1058_v57  ;;  %2311 = vmatprep.mubr.f32.mxu0 %v1207_v55  ;;  %v1210_v59 = vmax.f32 %v1064_v56, 0.0 }
 0x1ea   :  { %v2191_v48 = vpop.f32.mrf.mxu1  ;;  %2312 = vmatmul.mubr.f32.gmra.mxu0 %v1208_v38 }
 0x1eb   :  { %v1209_v58 = vmax.f32 %v1059_v7, 0.0  ;;  %v1074_v20 = vadd.f32 %v2191_v48, %v2885_v54  ;;  %v2954_v7 = vld [vmem:[%s3282_s6] ss:$0 sm:$0xff] }
 0x1ec   :  { %v1068_v26 = vpop.f32.mrf.mxu1 }
 0x1ed   :  { %v1069_v60 = vadd.f32 %v2885_v54, %v1068_v26  ;;  %2314 = vmatprep.mubr.f32.mxu0 %v1209_v58  ;;  %v1212_v0 = vmax.f32 %v1074_v20, 0.0 }
 0x1ee   :  { %v2194_v63 = vpop.f32.mrf.mxu1  ;;  %2315 = vmatmul.mubr.f32.gmra.mxu0 %v1210_v59 }
 0x1ef   :  { %v1211_v62 = vmax.f32 %v1069_v60, 0.0  ;;  %v1084_v1 = vadd.f32 %v2194_v63, %v2885_v54 }
 0x1f0   :  { %v1078_v2 = vpop.f32.mrf.mxu1 }
 0x1f1   :  { %v1079_v3 = vadd.f32 %v2885_v54, %v1078_v2  ;;  %2317 = vmatprep.mubr.f32.mxu0 %v1211_v62  ;;  %v1214_v16 = vmax.f32 %v1084_v1, 0.0 }
 0x1f2   :  { %v2197_v45 = vpop.f32.mrf.mxu1  ;;  %2318 = vmatmul.mubr.f32.gmra.mxu0 %v1212_v0 }
 0x1f3   :  { %v1213_v4 = vmax.f32 %v1079_v3, 0.0  ;;  %v1094_v6 = vadd.f32 %v2197_v45, %v2885_v54 }
 0x1f4   :  { %v1088_v8 = vpop.f32.mrf.mxu1 }
 0x1f5   :  { %v1089_v61 = vadd.f32 %v2885_v54, %v1088_v8  ;;  %2320 = vmatprep.mubr.f32.mxu0 %v1213_v4  ;;  %v1216_v10 = vmax.f32 %v1094_v6, 0.0 }
 0x1f6   :  { %v2200_v9 = vpop.f32.mrf.mxu1  ;;  %2321 = vmatmul.mubr.f32.gmra.mxu0 %v1214_v16 }
 0x1f7   :  { %v1215_v36 = vmax.f32 %v1089_v61, 0.0  ;;  %v1104_v11 = vadd.f32 %v2200_v9, %v2885_v54 }
 0x1f8   :  { %v1098_v12 = vpop.f32.mrf.mxu1 }
 0x1f9   :  { %v1099_v13 = vadd.f32 %v2885_v54, %v1098_v12  ;;  %2323 = vmatprep.mubr.f32.mxu0 %v1215_v36  ;;  %v1218_v15 = vmax.f32 %v1104_v11, 0.0 }
 0x1fa   :  { %v2203_v53 = vpop.f32.mrf.mxu1  ;;  %2324 = vmatmul.mubr.f32.gmra.mxu0 %v1216_v10 }
 0x1fb   :  { %v1217_v14 = vmax.f32 %v1099_v13, 0.0  ;;  %v1114_v17 = vadd.f32 %v2203_v53, %v2885_v54 }
 0x1fc   :  { %v1108_v18 = vpop.f32.mrf.mxu1 }
 0x1fd   :  { %v1109_v5 = vadd.f32 %v2885_v54, %v1108_v18  ;;  %2326 = vmatprep.mubr.f32.mxu0 %v1217_v14  ;;  %v1220_v23 = vmax.f32 %v1114_v17, 0.0 }
 0x1fe   :  { %v2206_v19 = vpop.f32.mrf.mxu1  ;;  %2327 = vmatmul.mubr.f32.gmra.mxu0 %v1218_v15 }
 0x1ff   :  { %v1219_v21 = vmax.f32 %v1109_v5, 0.0  ;;  %v1124_v24 = vadd.f32 %v2206_v19, %v2885_v54 }
 0x200   :  { %v1118_v25 = vpop.f32.mrf.mxu1 }
 0x201   :  { %v1119_v22 = vadd.f32 %v2885_v54, %v1118_v25  ;;  %2329 = vmatprep.mubr.f32.mxu0 %v1219_v21  ;;  %v1222_v30 = vmax.f32 %v1124_v24, 0.0 }
 0x202   :  { %v2209_v28 = vpop.f32.mrf.mxu1  ;;  %2330 = vmatmul.mubr.f32.gmra.mxu0 %v1220_v23 }
 0x203   :  { %v1221_v29 = vmax.f32 %v1119_v22, 0.0  ;;  %v1134_v31 = vadd.f32 %v2209_v28, %v2885_v54 }
 0x204   :  { %v1128_v32 = vpop.f32.mrf.mxu1 }
 0x205   :  { %v1129_v33 = vadd.f32 %v2885_v54, %v1128_v32  ;;  %2332 = vmatprep.mubr.f32.mxu0 %v1221_v29  ;;  %v1224_v39 = vmax.f32 %v1134_v31, 0.0 }
 0x206   :  { %v2212_v35 = vpop.f32.mrf.mxu1  ;;  %2333 = vmatmul.mubr.f32.gmra.mxu0 %v1222_v30 }
 0x207   :  { %v1223_v37 = vmax.f32 %v1129_v33, 0.0  ;;  %v1144_v40 = vadd.f32 %v2212_v35, %v2885_v54 }
 0x208   :  { %v1138_v41 = vpop.f32.mrf.mxu1 }
 0x209   :  { %v1139_v42 = vadd.f32 %v2885_v54, %v1138_v41  ;;  %2335 = vmatprep.mubr.f32.mxu0 %v1223_v37  ;;  %v1226_v46 = vmax.f32 %v1144_v40, 0.0 }
 0x20a   :  { %v2215_v34 = vpop.f32.mrf.mxu1  ;;  %2336 = vmatmul.mubr.f32.gmra.mxu0 %v1224_v39 }
 0x20b   :  { %v1225_v43 = vmax.f32 %v1139_v42, 0.0  ;;  %v1154_v47 = vadd.f32 %v2215_v34, %v2885_v54 }
 0x20c   :  { %v1148_v49 = vpop.f32.mrf.mxu1 }
 0x20d   :  { %v1149_v44 = vadd.f32 %v2885_v54, %v1148_v49  ;;  %2338 = vmatprep.mubr.f32.mxu0 %v1225_v43  ;;  %v1228_v51 = vmax.f32 %v1154_v47, 0.0 }
 0x20e   :  { %v2218_v27 = vpop.f32.mrf.mxu1  ;;  %2339 = vmatmul.mubr.f32.gmra.mxu0 %v1226_v46 }
 0x20f   :  { %v1227_v50 = vmax.f32 %v1149_v44, 0.0  ;;  %v1164_v52 = vadd.f32 %v2218_v27, %v2885_v54 }
 0x210   :  { %v1158_v55 = vpop.f32.mrf.mxu1 }
 0x211   :  { %v1159_v38 = vadd.f32 %v2885_v54, %v1158_v55  ;;  %2341 = vmatprep.mubr.f32.mxu0 %v1227_v50  ;;  %v1230_v57 = vmax.f32 %v1164_v52, 0.0 }
 0x212   :  { %2342 = vmatmul.mubr.f32.gmra.mxu0 %v1228_v51 }
 0x213   :  { %v1229_v56 = vmax.f32 %v1159_v38, 0.0 }
 0x215   :  { %2344 = vmatprep.mubr.f32.mxu0 %v1229_v56 }
 0x216   :  { %2345 = vmatmul.mubr.f32.gmra.mxu0 %v1230_v57 }
 0x25a   :  { %v2253_v48 = vpop.f32.mrf.mxu0 }
 0x25b   :  { %v1310_v58 = vadd.f32 %v2253_v48, %v2954_v7 }
 0x25c   :  { %v1304_v59 = vpop.f32.mrf.mxu0 }
 0x25d   :  { %1625 = vst.msk [vmem:[%s3283_s7 + $0x8] sm:$0xff] %vm1623_vm1, %v1310_v58  ;;  %v1305_v54 = vadd.f32 %v2954_v7, %v1304_v59 }
 0x25e   :  { %v2256_v20 = vpop.f32.mrf.mxu0 }
 0x25f   :  { %1624 = vst.msk [vmem:[%s3283_s7] sm:$0xff] %vm1623_vm1, %v1305_v54  ;;  %v1320_v26 = vadd.f32 %v2256_v20, %v2954_v7 }
 0x260   :  { %v1314_v60 = vpop.f32.mrf.mxu0 }
 0x261   :  { %1627 = vst.msk [vmem:[%s3283_s7 + $0x18] sm:$0xff] %vm1623_vm1, %v1320_v26  ;;  %v1315_v63 = vadd.f32 %v2954_v7, %v1314_v60 }
 0x262   :  { %v2259_v62 = vpop.f32.mrf.mxu0 }
 0x263   :  { %1626 = vst.msk [vmem:[%s3283_s7 + $0x10] sm:$0xff] %vm1623_vm1, %v1315_v63  ;;  %v1330_v0 = vadd.f32 %v2259_v62, %v2954_v7 }
 0x264   :  { %v1324_v1 = vpop.f32.mrf.mxu0 }
 0x265   :  { %1629 = vst.msk [vmem:[%s3283_s7 + $0x28] sm:$0xff] %vm1623_vm1, %v1330_v0  ;;  %v1325_v2 = vadd.f32 %v2954_v7, %v1324_v1 }
 0x266   :  { %v2262_v3 = vpop.f32.mrf.mxu0 }
 0x267   :  { %1628 = vst.msk [vmem:[%s3283_s7 + $0x20] sm:$0xff] %vm1623_vm1, %v1325_v2  ;;  %v1340_v45 = vadd.f32 %v2262_v3, %v2954_v7 }
 0x268   :  { %v1334_v4 = vpop.f32.mrf.mxu0 }
 0x269   :  { %1631 = vst.msk [vmem:[%s3283_s7 + $0x38] sm:$0xff] %vm1623_vm1, %v1340_v45  ;;  %v1335_v16 = vadd.f32 %v2954_v7, %v1334_v4 }
 0x26a   :  { %v2265_v6 = vpop.f32.mrf.mxu0 }
 0x26b   :  { %1630 = vst.msk [vmem:[%s3283_s7 + $0x30] sm:$0xff] %vm1623_vm1, %v1335_v16  ;;  %v1350_v8 = vadd.f32 %v2265_v6, %v2954_v7 }
 0x26c   :  { %v1344_v61 = vpop.f32.mrf.mxu0 }
 0x26d   :  { %1633 = vst.msk [vmem:[%s3283_s7 + $0x48] sm:$0xff] %vm1623_vm1, %v1350_v8  ;;  %v1345_v9 = vadd.f32 %v2954_v7, %v1344_v61 }
 0x26e   :  { %v2268_v36 = vpop.f32.mrf.mxu0 }
 0x26f   :  { %1632 = vst.msk [vmem:[%s3283_s7 + $0x40] sm:$0xff] %vm1623_vm1, %v1345_v9  ;;  %v1360_v10 = vadd.f32 %v2268_v36, %v2954_v7 }
 0x270   :  { %v1354_v11 = vpop.f32.mrf.mxu0 }
 0x271   :  { %1635 = vst.msk [vmem:[%s3283_s7 + $0x58] sm:$0xff] %vm1623_vm1, %v1360_v10  ;;  %v1355_v12 = vadd.f32 %v2954_v7, %v1354_v11 }
 0x272   :  { %v2271_v13 = vpop.f32.mrf.mxu0 }
 0x273   :  { %1634 = vst.msk [vmem:[%s3283_s7 + $0x50] sm:$0xff] %vm1623_vm1, %v1355_v12  ;;  %v1370_v53 = vadd.f32 %v2271_v13, %v2954_v7 }
 0x274   :  { %v1364_v14 = vpop.f32.mrf.mxu0 }
 0x275   :  { %1637 = vst.msk [vmem:[%s3283_s7 + $0x68] sm:$0xff] %vm1623_vm1, %v1370_v53  ;;  %v1365_v15 = vadd.f32 %v2954_v7, %v1364_v14 }
 0x276   :  { %v2274_v17 = vpop.f32.mrf.mxu0 }
 0x277   :  { %1636 = vst.msk [vmem:[%s3283_s7 + $0x60] sm:$0xff] %vm1623_vm1, %v1365_v15  ;;  %v1380_v18 = vadd.f32 %v2274_v17, %v2954_v7 }
 0x278   :  { %v1374_v5 = vpop.f32.mrf.mxu0 }
 0x279   :  { %1639 = vst.msk [vmem:[%s3283_s7 + $0x78] sm:$0xff] %vm1623_vm1, %v1380_v18  ;;  %v1375_v19 = vadd.f32 %v2954_v7, %v1374_v5 }
 0x27a   :  { %v2277_v21 = vpop.f32.mrf.mxu0 }
 0x27b   :  { %1638 = vst.msk [vmem:[%s3283_s7 + $0x70] sm:$0xff] %vm1623_vm1, %v1375_v19  ;;  %v1390_v23 = vadd.f32 %v2277_v21, %v2954_v7 }
 0x27c   :  { %v1384_v24 = vpop.f32.mrf.mxu0 }
 0x27d   :  { %1641 = vst.msk [vmem:[%s3283_s7 + $0x88] sm:$0xff] %vm1623_vm1, %v1390_v23  ;;  %v1385_v25 = vadd.f32 %v2954_v7, %v1384_v24 }
 0x27e   :  { %v2280_v22 = vpop.f32.mrf.mxu0 }
 0x27f   :  { %1640 = vst.msk [vmem:[%s3283_s7 + $0x80] sm:$0xff] %vm1623_vm1, %v1385_v25  ;;  %v1400_v28 = vadd.f32 %v2280_v22, %v2954_v7 }
 0x280   :  { %v1394_v29 = vpop.f32.mrf.mxu0 }
 0x281   :  { %1643 = vst.msk [vmem:[%s3283_s7 + $0x98] sm:$0xff] %vm1623_vm1, %v1400_v28  ;;  %v1395_v30 = vadd.f32 %v2954_v7, %v1394_v29 }
 0x282   :  { %v2283_v31 = vpop.f32.mrf.mxu0 }
 0x283   :  { %1642 = vst.msk [vmem:[%s3283_s7 + $0x90] sm:$0xff] %vm1623_vm1, %v1395_v30  ;;  %v1410_v32 = vadd.f32 %v2283_v31, %v2954_v7 }
 0x284   :  { %v1404_v33 = vpop.f32.mrf.mxu0 }
 0x285   :  { %1645 = vst.msk [vmem:[%s3283_s7 + $0xa8] sm:$0xff] %vm1623_vm1, %v1410_v32  ;;  %v1405_v35 = vadd.f32 %v2954_v7, %v1404_v33 }
 0x286   :  { %v2286_v37 = vpop.f32.mrf.mxu0 }
 0x287   :  { %1644 = vst.msk [vmem:[%s3283_s7 + $0xa0] sm:$0xff] %vm1623_vm1, %v1405_v35  ;;  %v1420_v39 = vadd.f32 %v2286_v37, %v2954_v7 }
 0x288   :  { %v1414_v40 = vpop.f32.mrf.mxu0 }
 0x289   :  { %1647 = vst.msk [vmem:[%s3283_s7 + $0xb8] sm:$0xff] %vm1623_vm1, %v1420_v39  ;;  %v1415_v41 = vadd.f32 %v2954_v7, %v1414_v40 }
 0x28a   :  { %v2289_v42 = vpop.f32.mrf.mxu0 }
 0x28b   :  { %1646 = vst.msk [vmem:[%s3283_s7 + $0xb0] sm:$0xff] %vm1623_vm1, %v1415_v41  ;;  %v1430_v34 = vadd.f32 %v2289_v42, %v2954_v7 }
 0x28c   :  { %v1424_v43 = vpop.f32.mrf.mxu0 }
 0x28d   :  { %1649 = vst.msk [vmem:[%s3283_s7 + $0xc8] sm:$0xff] %vm1623_vm1, %v1430_v34  ;;  %v1425_v46 = vadd.f32 %v2954_v7, %v1424_v43 }
 0x28e   :  { %v2292_v47 = vpop.f32.mrf.mxu0 }
 0x28f   :  { %1648 = vst.msk [vmem:[%s3283_s7 + $0xc0] sm:$0xff] %vm1623_vm1, %v1425_v46  ;;  %v1440_v49 = vadd.f32 %v2292_v47, %v2954_v7 }
 0x290   :  { %v1434_v44 = vpop.f32.mrf.mxu0 }
 0x291   :  { %1651 = vst.msk [vmem:[%s3283_s7 + $0xd8] sm:$0xff] %vm1623_vm1, %v1440_v49  ;;  %v1435_v27 = vadd.f32 %v2954_v7, %v1434_v44 }
 0x292   :  { %v2295_v50 = vpop.f32.mrf.mxu0 }
 0x293   :  { %1650 = vst.msk [vmem:[%s3283_s7 + $0xd0] sm:$0xff] %vm1623_vm1, %v1435_v27  ;;  %v1450_v51 = vadd.f32 %v2295_v50, %v2954_v7 }
 0x294   :  { %v1444_v52 = vpop.f32.mrf.mxu0 }
 0x295   :  { %1653 = vst.msk [vmem:[%s3283_s7 + $0xe8] sm:$0xff] %vm1623_vm1, %v1450_v51  ;;  %v1445_v55 = vadd.f32 %v2954_v7, %v1444_v52 }
 0x296   :  { %v2298_v38 = vpop.f32.mrf.mxu0 }
 0x297   :  { %1652 = vst.msk [vmem:[%s3283_s7 + $0xe0] sm:$0xff] %vm1623_vm1, %v1445_v55  ;;  %v1460_v56 = vadd.f32 %v2298_v38, %v2954_v7 }
 0x298   :  { %v1454_v57 = vpop.f32.mrf.mxu0 }
 0x299   :  { %1655 = vst.msk [vmem:[%s3283_s7 + $0xf8] sm:$0xff] %vm1623_vm1, %v1460_v56  ;;  %v1455_v48 = vadd.f32 %v2954_v7, %v1454_v57 }
 0x29a   :  { %v2301_v58 = vpop.f32.mrf.mxu0 }
 0x29b   :  { %1654 = vst.msk [vmem:[%s3283_s7 + $0xf0] sm:$0xff] %vm1623_vm1, %v1455_v48  ;;  %v1470_v59 = vadd.f32 %v2301_v58, %v2954_v7 }
 0x29c   :  { %v1464_v54 = vpop.f32.mrf.mxu0 }
 0x29d   :  { %1657 = vst.msk [vmem:[%s3283_s7 + $0x108] sm:$0xff] %vm1623_vm1, %v1470_v59  ;;  %v1465_v20 = vadd.f32 %v2954_v7, %v1464_v54 }
 0x29e   :  { %v2304_v26 = vpop.f32.mrf.mxu0 }
 0x29f   :  { %1656 = vst.msk [vmem:[%s3283_s7 + $0x100] sm:$0xff] %vm1623_vm1, %v1465_v20  ;;  %v1480_v60 = vadd.f32 %v2304_v26, %v2954_v7 }
 0x2a0   :  { %v1474_v63 = vpop.f32.mrf.mxu0 }
 0x2a1   :  { %1659 = vst.msk [vmem:[%s3283_s7 + $0x118] sm:$0xff] %vm1623_vm1, %v1480_v60  ;;  %v1475_v62 = vadd.f32 %v2954_v7, %v1474_v63 }
 0x2a2   :  { %v2307_v0 = vpop.f32.mrf.mxu0 }
 0x2a3   :  { %1658 = vst.msk [vmem:[%s3283_s7 + $0x110] sm:$0xff] %vm1623_vm1, %v1475_v62  ;;  %v1490_v1 = vadd.f32 %v2307_v0, %v2954_v7 }
 0x2a4   :  { %v1484_v2 = vpop.f32.mrf.mxu0 }
 0x2a5   :  { %1661 = vst.msk [vmem:[%s3283_s7 + $0x128] sm:$0xff] %vm1623_vm1, %v1490_v1  ;;  %v1485_v3 = vadd.f32 %v2954_v7, %v1484_v2 }
 0x2a6   :  { %v2310_v45 = vpop.f32.mrf.mxu0 }
 0x2a7   :  { %1660 = vst.msk [vmem:[%s3283_s7 + $0x120] sm:$0xff] %vm1623_vm1, %v1485_v3  ;;  %v1500_v4 = vadd.f32 %v2310_v45, %v2954_v7 }
 0x2a8   :  { %v1494_v16 = vpop.f32.mrf.mxu0 }
 0x2a9   :  { %1663 = vst.msk [vmem:[%s3283_s7 + $0x138] sm:$0xff] %vm1623_vm1, %v1500_v4  ;;  %v1495_v6 = vadd.f32 %v2954_v7, %v1494_v16 }
 0x2aa   :  { %v2313_v8 = vpop.f32.mrf.mxu0 }
 0x2ab   :  { %1662 = vst.msk [vmem:[%s3283_s7 + $0x130] sm:$0xff] %vm1623_vm1, %v1495_v6  ;;  %v1510_v61 = vadd.f32 %v2313_v8, %v2954_v7 }
 0x2ac   :  { %v1504_v9 = vpop.f32.mrf.mxu0 }
 0x2ad   :  { %1665 = vst.msk [vmem:[%s3283_s7 + $0x148] sm:$0xff] %vm1623_vm1, %v1510_v61  ;;  %v1505_v36 = vadd.f32 %v2954_v7, %v1504_v9 }
 0x2ae   :  { %v2316_v10 = vpop.f32.mrf.mxu0 }
 0x2af   :  { %1664 = vst.msk [vmem:[%s3283_s7 + $0x140] sm:$0xff] %vm1623_vm1, %v1505_v36  ;;  %v1520_v11 = vadd.f32 %v2316_v10, %v2954_v7 }
 0x2b0   :  { %v1514_v12 = vpop.f32.mrf.mxu0 }
 0x2b1   :  { %1667 = vst.msk [vmem:[%s3283_s7 + $0x158] sm:$0xff] %vm1623_vm1, %v1520_v11  ;;  %v1515_v13 = vadd.f32 %v2954_v7, %v1514_v12 }
 0x2b2   :  { %v2319_v53 = vpop.f32.mrf.mxu0 }
 0x2b3   :  { %1666 = vst.msk [vmem:[%s3283_s7 + $0x150] sm:$0xff] %vm1623_vm1, %v1515_v13  ;;  %v1530_v14 = vadd.f32 %v2319_v53, %v2954_v7 }
 0x2b4   :  { %v1524_v15 = vpop.f32.mrf.mxu0 }
 0x2b5   :  { %1669 = vst.msk [vmem:[%s3283_s7 + $0x168] sm:$0xff] %vm1623_vm1, %v1530_v14  ;;  %v1525_v17 = vadd.f32 %v2954_v7, %v1524_v15 }
 0x2b6   :  { %v2322_v18 = vpop.f32.mrf.mxu0 }
 0x2b7   :  { %1668 = vst.msk [vmem:[%s3283_s7 + $0x160] sm:$0xff] %vm1623_vm1, %v1525_v17  ;;  %v1540_v5 = vadd.f32 %v2322_v18, %v2954_v7 }
 0x2b8   :  { %v1534_v19 = vpop.f32.mrf.mxu0 }
 0x2b9   :  { %1671 = vst.msk [vmem:[%s3283_s7 + $0x178] sm:$0xff] %vm1623_vm1, %v1540_v5  ;;  %v1535_v21 = vadd.f32 %v2954_v7, %v1534_v19 }
 0x2ba   :  { %v2325_v23 = vpop.f32.mrf.mxu0 }
 0x2bb   :  { %1670 = vst.msk [vmem:[%s3283_s7 + $0x170] sm:$0xff] %vm1623_vm1, %v1535_v21  ;;  %v1550_v24 = vadd.f32 %v2325_v23, %v2954_v7 }
 0x2bc   :  { %v1544_v25 = vpop.f32.mrf.mxu0 }
 0x2bd   :  { %1673 = vst.msk [vmem:[%s3283_s7 + $0x188] sm:$0xff] %vm1623_vm1, %v1550_v24  ;;  %v1545_v22 = vadd.f32 %v2954_v7, %v1544_v25 }
 0x2be   :  { %v2328_v28 = vpop.f32.mrf.mxu0 }
 0x2bf   :  { %1672 = vst.msk [vmem:[%s3283_s7 + $0x180] sm:$0xff] %vm1623_vm1, %v1545_v22  ;;  %v1560_v29 = vadd.f32 %v2328_v28, %v2954_v7 }
 0x2c0   :  { %v1554_v30 = vpop.f32.mrf.mxu0 }
 0x2c1   :  { %1675 = vst.msk [vmem:[%s3283_s7 + $0x198] sm:$0xff] %vm1623_vm1, %v1560_v29  ;;  %v1555_v31 = vadd.f32 %v2954_v7, %v1554_v30 }
 0x2c2   :  { %v2331_v32 = vpop.f32.mrf.mxu0 }
 0x2c3   :  { %1674 = vst.msk [vmem:[%s3283_s7 + $0x190] sm:$0xff] %vm1623_vm1, %v1555_v31  ;;  %v1570_v33 = vadd.f32 %v2331_v32, %v2954_v7 }
 0x2c4   :  { %v1564_v35 = vpop.f32.mrf.mxu0 }
 0x2c5   :  { %1677 = vst.msk [vmem:[%s3283_s7 + $0x1a8] sm:$0xff] %vm1623_vm1, %v1570_v33  ;;  %v1565_v37 = vadd.f32 %v2954_v7, %v1564_v35 }
 0x2c6   :  { %v2334_v39 = vpop.f32.mrf.mxu0 }
 0x2c7   :  { %1676 = vst.msk [vmem:[%s3283_s7 + $0x1a0] sm:$0xff] %vm1623_vm1, %v1565_v37  ;;  %v1580_v40 = vadd.f32 %v2334_v39, %v2954_v7 }
 0x2c8   :  { %v1574_v41 = vpop.f32.mrf.mxu0 }
 0x2c9   :  { %1679 = vst.msk [vmem:[%s3283_s7 + $0x1b8] sm:$0xff] %vm1623_vm1, %v1580_v40  ;;  %v1575_v42 = vadd.f32 %v2954_v7, %v1574_v41 }
 0x2ca   :  { %v2337_v34 = vpop.f32.mrf.mxu0 }
 0x2cb   :  { %1678 = vst.msk [vmem:[%s3283_s7 + $0x1b0] sm:$0xff] %vm1623_vm1, %v1575_v42  ;;  %v1590_v43 = vadd.f32 %v2337_v34, %v2954_v7 }
 0x2cc   :  { %v1584_v46 = vpop.f32.mrf.mxu0 }
 0x2cd   :  { %1681 = vst.msk [vmem:[%s3283_s7 + $0x1c8] sm:$0xff] %vm1623_vm1, %v1590_v43  ;;  %v1585_v47 = vadd.f32 %v2954_v7, %v1584_v46 }
 0x2ce   :  { %v2340_v49 = vpop.f32.mrf.mxu0 }
 0x2cf   :  { %1680 = vst.msk [vmem:[%s3283_s7 + $0x1c0] sm:$0xff] %vm1623_vm1, %v1585_v47  ;;  %v1600_v44 = vadd.f32 %v2340_v49, %v2954_v7 }
 0x2d0   :  { %v1594_v27 = vpop.f32.mrf.mxu0 }
 0x2d1   :  { %1683 = vst.msk [vmem:[%s3283_s7 + $0x1d8] sm:$0xff] %vm1623_vm1, %v1600_v44  ;;  %v1595_v50 = vadd.f32 %v2954_v7, %v1594_v27 }
 0x2d2   :  { %v2343_v51 = vpop.f32.mrf.mxu0 }
 0x2d3   :  { %1682 = vst.msk [vmem:[%s3283_s7 + $0x1d0] sm:$0xff] %vm1623_vm1, %v1595_v50  ;;  %v1610_v52 = vadd.f32 %v2343_v51, %v2954_v7 }
 0x2d4   :  { %v1604_v55 = vpop.f32.mrf.mxu0 }
 0x2d5   :  { %1685 = vst.msk [vmem:[%s3283_s7 + $0x1e8] sm:$0xff] %vm1623_vm1, %v1610_v52  ;;  %v1605_v38 = vadd.f32 %v2954_v7, %v1604_v55 }
 0x2d6   :  { %v2346_v56 = vpop.f32.mrf.mxu0 }
 0x2d7   :  { %1684 = vst.msk [vmem:[%s3283_s7 + $0x1e0] sm:$0xff] %vm1623_vm1, %v1605_v38  ;;  %v1620_v57 = vadd.f32 %v2346_v56, %v2954_v7 }
 0x2d8   :  { %v1614_v48 = vpop.f32.mrf.mxu0 }
 0x2d9   :  { %1687 = vst.msk [vmem:[%s3283_s7 + $0x1f8] sm:$0xff] %vm1623_vm1, %v1620_v57  ;;  %v1615_v58 = vadd.f32 %v2954_v7, %v1614_v48 }
 0x2db   :  { %1686 = vst.msk [vmem:[%s3283_s7 + $0x1f0] sm:$0xff] %vm1623_vm1, %v1615_v58 }

</bundles_post_ra>
